<compile_context>
chip_gen: v6e
topology: v6e:2x2x1
jax: 0.10.0
libtpu: 0.0.40
codegen_flags: <defaults>
</compile_context>

<pallas_src>
import functools

import numpy as np
import jax
import jax.numpy as jnp
from jax.experimental import pallas as pl
from jax.experimental.pallas import tpu as pltpu


def _round_up(v, m):
    return (v + m - 1) // m * m


# ---------------------------------------------------------------------------
# Fused kernel: backbone conv -> FPN convs -> pred convs -> YOLO decode
# ---------------------------------------------------------------------------
def _fused_yolo_kernel(x_ref, g_ref, wb_ref, bb_ref, w1_ref, b1_ref,
                       w2_ref, b2_ref, sel_ref, aw_ref, ah_ref, o_ref,
                       *, stride):
    # backbone stand-in: 1x1 conv + ReLU (bf16 MXU inputs, f32 accumulate)
    feat = jnp.dot(x_ref[...], wb_ref[...],
                   preferred_element_type=jnp.float32)
    feat = jnp.maximum(feat + bb_ref[...], 0.0)

    # all three FPN 1x1 convs in one matmul (weights concatenated along N)
    f = jnp.dot(feat.astype(jnp.bfloat16), w1_ref[...],
                preferred_element_type=jnp.float32) + b1_ref[...]

    # all three prediction heads in one matmul (block-diagonal, lane-padded)
    p = jnp.dot(f.astype(jnp.bfloat16), w2_ref[...],
                preferred_element_type=jnp.float32) + b2_ref[...]

    # YOLO decode, fully vectorised over (rows, lanes); f32 VPU/EUP math.
    sig = jax.nn.sigmoid(p)
    ex = jnp.exp(p)
    gx = g_ref[:, 0:1]                       # (tm, 1) fp32 grid-x per row
    gy = g_ref[:, 1:2]                       # (tm, 1) fp32 grid-y per row
    sel = sel_ref[...]                       # (1, Ntot) int32 channel mode
    out = jnp.where(sel == 0, (sig + gx) * stride,          # box x
          jnp.where(sel == 1, (sig + gy) * stride,          # box y
          jnp.where(sel == 2, ex * aw_ref[...],             # box w (px)
          jnp.where(sel == 3, ex * ah_ref[...],             # box h (px)
                    sig))))                                  # conf / classes
    o_ref[...] = out


# ---------------------------------------------------------------------------
# YOLODetector in JAX/Pallas
# ---------------------------------------------------------------------------
class YOLODetectorPallas:
    NUM_HEADS = 3
    NUM_ANCHORS = 3

    def __init__(self, num_classes, img_dim=416, c_in=4, c_feat=64, c_fpn=32,
                 row_tile=512, key=jax.random.PRNGKey(42)):
        self.num_classes = num_classes
        self.img_dim = img_dim
        self.row_tile = row_tile

        A = self.NUM_ANCHORS
        C5 = num_classes + 5
        Np = _round_up(A * C5, 128)              # per-head lane-padded width
        Ntot = self.NUM_HEADS * Np
        self._Np = Np

        # Reference anchors (flat lists of 6) interpreted as 3 (w, h) pairs.
        flat_anchors = [[116, 90, 156, 198, 373, 326],
                        [30, 61, 62, 45, 59, 119],
                        [10, 13, 16, 30, 33, 23]]
        anchor_pairs = [[(a[2 * j], a[2 * j + 1]) for j in range(A)]
                        for a in flat_anchors]

        def init_w(k, fan_in, fan_out):
            return (0.1 * jax.random.normal(k, (fan_in, fan_out), jnp.float32)
                    / np.sqrt(np.float32(fan_in)))

        keys = jax.random.split(key, 8)

        # backbone stand-in weights (resnet18 replaced; see header comment)
        self.wb = init_w(keys[0], c_in, c_feat).astype(jnp.bfloat16)
        self.bb = jnp.zeros((1, c_feat), jnp.float32)

        # 3 FPN 1x1 convs concatenated along N -> (c_feat, 3*c_fpn)
        # (the reference's 4th FPN conv is never used -> omitted)
        fpn_w = [init_w(keys[1 + i], c_feat, c_fpn) for i in range(3)]
        fpn_b = [np.full((c_fpn,), 0.01 * (i + 1), np.float32)
                 for i in range(3)]
        self.w1 = jnp.concatenate(fpn_w, axis=1).astype(jnp.bfloat16)
        self.b1 = jnp.asarray(np.concatenate(fpn_b))[None, :]

        # 3 pred 1x1 convs as one block-diagonal, lane-padded weight
        pred_w = [init_w(keys[4 + i], c_fpn, A * C5) for i in range(3)]
        pred_b = [np.full((A * C5,), 0.005 * (i + 1), np.float32)
                  for i in range(3)]
        w2 = jnp.zeros((self.NUM_HEADS * c_fpn, Ntot), jnp.float32)
        b2 = np.zeros((Ntot,), np.float32)
        for h in range(self.NUM_HEADS):
            w2 = w2.at[h * c_fpn:(h + 1) * c_fpn,
                       h * Np:h * Np + A * C5].set(pred_w[h])
            b2[h * Np:h * Np + A * C5] = pred_b[h]
        self.w2 = w2.astype(jnp.bfloat16)
        self.b2 = jnp.asarray(b2)[None, :]

        # Per-lane decode metadata: channel mode + raw anchor w/h.
        # (exp(w) * (a/stride) * stride == exp(w) * a, so raw anchors suffice.)
        sel = np.full((Ntot,), 4, np.int32)
        aw = np.ones((Ntot,), np.float32)
        ah = np.ones((Ntot,), np.float32)
        for h in range(self.NUM_HEADS):
            for a in range(A):
                base = h * Np + a * C5
                sel[base + 0] = 0
                sel[base + 1] = 1
                sel[base + 2] = 2
                sel[base + 3] = 3
                aw[base + 2] = anchor_pairs[h][a][0]
                ah[base + 3] = anchor_pairs[h][a][1]
        self.sel = jnp.asarray(sel)[None, :]
        self.aw = jnp.asarray(aw)[None, :]
        self.ah = jnp.asarray(ah)[None, :]

        self._forward = jax.jit(self._forward_impl)

    # ------------------------------------------------------------------
    def _forward_impl(self, x):
        B, C_in, H, W = x.shape
        # backbone stand-in: stride-2 spatial subsample (resnet18 omitted)
        xs = x[:, :, ::2, ::2]
        G = xs.shape[2]
        stride = float(self.img_dim) / float(G)

        M = B * G * G
        tm = min(self.row_tile, _round_up(M, 8))
        M_pad = _round_up(M, tm)

        # channels-last rows; bf16 for the MXU
        rows = jnp.transpose(xs, (0, 2, 3, 1)).reshape(M, C_in)
        rows = rows.astype(jnp.bfloat16)
        if M_pad > M:
            rows = jnp.pad(rows, ((0, M_pad - M), (0, 0)))

        # fp32 (gx, gy) per row, precomputed (no int div/mod in the kernel)
        rr = np.arange(M_pad)
        s = rr % (G * G)
        gxy = jnp.asarray(np.stack([(s % G).astype(np.float32),
                                    (s // G).astype(np.float32)], axis=1))

        Ntot = self.sel.shape[1]
        c_feat = self.wb.shape[1]
        c_fpn3 = self.w1.shape[1]
        grid = (M_pad // tm,)

        tiled = lambda i: (i, 0)
        resident = lambda i: (0, 0)

        flops = 2 * M_pad * (C_in * c_feat + c_feat * c_fpn3 + c_fpn3 * Ntot)
        bytes_acc = (rows.size * 2 + gxy.size * 4 + M_pad * Ntot * 4
                     + self.wb.size * 2 + self.w1.size * 2 + self.w2.size * 2
                     + (self.bb.size + self.b1.size + self.b2.size
                        + self.sel.size + self.aw.size + self.ah.size) * 4)

        out_rows = pl.pallas_call(
            functools.partial(_fused_yolo_kernel, stride=stride),
            out_shape=jax.ShapeDtypeStruct((M_pad, Ntot), jnp.float32),
            grid=grid,
            in_specs=[
                pl.BlockSpec((tm, C_in), tiled),       # input rows
                pl.BlockSpec((tm, 2), tiled),          # (gx, gy) per row
                pl.BlockSpec(self.wb.shape, resident),
                pl.BlockSpec(self.bb.shape, resident),
                pl.BlockSpec(self.w1.shape, resident),
                pl.BlockSpec(self.b1.shape, resident),
                pl.BlockSpec(self.w2.shape, resident),
                pl.BlockSpec(self.b2.shape, resident),
                pl.BlockSpec(self.sel.shape, resident),
                pl.BlockSpec(self.aw.shape, resident),
                pl.BlockSpec(self.ah.shape, resident),
            ],
            out_specs=pl.BlockSpec((tm, Ntot), tiled),
            compiler_params=pltpu.CompilerParams(
                dimension_semantics=("parallel",),
                vmem_limit_bytes=32 * 1024 * 1024),
            cost_estimate=pl.CostEstimate(
                flops=flops,
                transcendentals=2 * M_pad * Ntot,
                bytes_accessed=bytes_acc),
        )(rows, gxy, self.wb, self.bb, self.w1, self.b1,
          self.w2, self.b2, self.sel, self.aw, self.ah)

        # rows (b, gy, gx) x lanes (head, anchor, c5, pad)
        #   -> (B, 3*A*G*G, 5+num_classes)  matching torch.cat(outputs, 1)
        A, C5, Np = self.NUM_ANCHORS, self.num_classes + 5, self._Np
        dec = out_rows[:M].reshape(B, G, G, self.NUM_HEADS, Np)[..., :A * C5]
        dec = dec.reshape(B, G, G, self.NUM_HEADS, A, C5)
        dec = jnp.transpose(dec, (0, 3, 4, 1, 2, 5))
        return dec.reshape(B, self.NUM_HEADS * A * G * G, C5)

    def __call__(self, x):
        return self._forward(x)


if __name__ == "__main__":
    key = jax.random.PRNGKey(0)
    kx, kp = jax.random.split(key)
    x = jax.random.normal(kx, (2, 4, 16, 16), jnp.float32)   # NCHW input

    model = YOLODetectorPallas(num_classes=3, img_dim=416, c_in=4, key=kp)
    out = jax.block_until_ready(model(x))

    B, G, A, C5 = 2, 8, 3, 3 + 5
    assert out.shape == (B, 3 * A * G * G, C5), out.shape
    assert bool(jnp.all(jnp.isfinite(out)))
    print("KERNEL_OK")
</pallas_src>

<mosaic_0001>
module attributes {stable_mosaic.version = 11 : i64} {
  func.func @_fused_yolo_kernel(%arg0: i32, %arg1: memref<128x4xbf16, #tpu.memory_space<vmem>>, %arg2: memref<128x2xf32, #tpu.memory_space<vmem>>, %arg3: memref<4x64xbf16, #tpu.memory_space<vmem>>, %arg4: memref<1x64xf32, #tpu.memory_space<vmem>>, %arg5: memref<64x96xbf16, #tpu.memory_space<vmem>>, %arg6: memref<1x96xf32, #tpu.memory_space<vmem>>, %arg7: memref<96x384xbf16, #tpu.memory_space<vmem>>, %arg8: memref<1x384xf32, #tpu.memory_space<vmem>>, %arg9: memref<1x384xi32, #tpu.memory_space<vmem>>, %arg10: memref<1x384xf32, #tpu.memory_space<vmem>>, %arg11: memref<1x384xf32, #tpu.memory_space<vmem>>, %arg12: memref<128x384xf32, #tpu.memory_space<vmem>>) attributes {dimension_semantics = [#tpu.dimension_semantics<parallel>], iteration_bounds = array<i64: 1>, scalar_prefetch = 0 : i64, scratch_operands = 0 : i64, tpu.core_type = #tpu.core_type<tc>, window_params = [{transform_indices = @transform_0, window_bounds = array<i64: 128, 4>}, {transform_indices = @transform_1, window_bounds = array<i64: 128, 2>}, {pipeline_mode = #tpu.pipeline_mode<synchronous>, transform_indices = @transform_2, window_bounds = array<i64: 4, 64>}, {pipeline_mode = #tpu.pipeline_mode<synchronous>, transform_indices = @transform_3, window_bounds = array<i64: 1, 64>}, {pipeline_mode = #tpu.pipeline_mode<synchronous>, transform_indices = @transform_4, window_bounds = array<i64: 64, 96>}, {pipeline_mode = #tpu.pipeline_mode<synchronous>, transform_indices = @transform_5, window_bounds = array<i64: 1, 96>}, {pipeline_mode = #tpu.pipeline_mode<synchronous>, transform_indices = @transform_6, window_bounds = array<i64: 96, 384>}, {pipeline_mode = #tpu.pipeline_mode<synchronous>, transform_indices = @transform_7, window_bounds = array<i64: 1, 384>}, {pipeline_mode = #tpu.pipeline_mode<synchronous>, transform_indices = @transform_8, window_bounds = array<i64: 1, 384>}, {pipeline_mode = #tpu.pipeline_mode<synchronous>, transform_indices = @transform_9, window_bounds = array<i64: 1, 384>}, {pipeline_mode = #tpu.pipeline_mode<synchronous>, transform_indices = @transform_10, window_bounds = array<i64: 1, 384>}, {transform_indices = @transform_11, window_bounds = array<i64: 128, 384>}]} {
    %c0 = arith.constant 0 : index
    %c0_0 = arith.constant 0 : index
    %0 = vector.load %arg1[%c0, %c0_0] : memref<128x4xbf16, #tpu.memory_space<vmem>>, vector<128x4xbf16>
    %c0_1 = arith.constant 0 : index
    %c0_2 = arith.constant 0 : index
    %1 = vector.load %arg3[%c0_1, %c0_2] : memref<4x64xbf16, #tpu.memory_space<vmem>>, vector<4x64xbf16>
    %cst = arith.constant dense<0.000000e+00> : vector<128x64xf32>
    %2 = tpu.matmul %0, %1, %cst {dimension_numbers = #tpu.dot_dimension_numbers<[1], [0], [0], [1], [0, 0, 1, 1], [], []>} : vector<128x4xbf16>, vector<4x64xbf16>, vector<128x64xf32> -> vector<128x64xf32>
    %c0_3 = arith.constant 0 : index
    %c0_4 = arith.constant 0 : index
    %3 = vector.load %arg4[%c0_3, %c0_4] : memref<1x64xf32, #tpu.memory_space<vmem>>, vector<1x64xf32>
    %4 = vector.broadcast %3 : vector<1x64xf32> to vector<128x64xf32>
    %5 = arith.addf %2, %4 : vector<128x64xf32>
    %cst_5 = arith.constant 0.000000e+00 : f32
    %6 = vector.broadcast %cst_5 : f32 to vector<128x64xf32>
    %7 = arith.maximumf %5, %6 : vector<128x64xf32>
    %8 = arith.truncf %7 : vector<128x64xf32> to vector<128x64xbf16>
    %c0_6 = arith.constant 0 : index
    %c0_7 = arith.constant 0 : index
    %9 = vector.load %arg5[%c0_6, %c0_7] : memref<64x96xbf16, #tpu.memory_space<vmem>>, vector<64x96xbf16>
    %cst_8 = arith.constant dense<0.000000e+00> : vector<128x96xf32>
    %10 = tpu.matmul %8, %9, %cst_8 {dimension_numbers = #tpu.dot_dimension_numbers<[1], [0], [0], [1], [0, 0, 1, 1], [], []>} : vector<128x64xbf16>, vector<64x96xbf16>, vector<128x96xf32> -> vector<128x96xf32>
    %c0_9 = arith.constant 0 : index
    %c0_10 = arith.constant 0 : index
    %11 = vector.load %arg6[%c0_9, %c0_10] : memref<1x96xf32, #tpu.memory_space<vmem>>, vector<1x96xf32>
    %12 = vector.broadcast %11 : vector<1x96xf32> to vector<128x96xf32>
    %13 = arith.addf %10, %12 : vector<128x96xf32>
    %14 = arith.truncf %13 : vector<128x96xf32> to vector<128x96xbf16>
    %c0_11 = arith.constant 0 : index
    %c0_12 = arith.constant 0 : index
    %15 = vector.load %arg7[%c0_11, %c0_12] : memref<96x384xbf16, #tpu.memory_space<vmem>>, vector<96x384xbf16>
    %cst_13 = arith.constant dense<0.000000e+00> : vector<128x384xf32>
    %16 = tpu.matmul %14, %15, %cst_13 {dimension_numbers = #tpu.dot_dimension_numbers<[1], [0], [0], [1], [0, 0, 1, 1], [], []>} : vector<128x96xbf16>, vector<96x384xbf16>, vector<128x384xf32> -> vector<128x384xf32>
    %c0_14 = arith.constant 0 : index
    %c0_15 = arith.constant 0 : index
    %17 = vector.load %arg8[%c0_14, %c0_15] : memref<1x384xf32, #tpu.memory_space<vmem>>, vector<1x384xf32>
    %18 = vector.broadcast %17 : vector<1x384xf32> to vector<128x384xf32>
    %19 = arith.addf %16, %18 : vector<128x384xf32>
    %20 = arith.negf %19 : vector<128x384xf32>
    %21 = math.exp %20 : vector<128x384xf32>
    %cst_16 = arith.constant 1.000000e+00 : f32
    %22 = vector.broadcast %cst_16 : f32 to vector<128x384xf32>
    %23 = arith.addf %22, %21 : vector<128x384xf32>
    %24 = arith.divf %22, %23 : vector<128x384xf32>
    %25 = math.exp %19 : vector<128x384xf32>
    %c0_17 = arith.constant 0 : index
    %c0_18 = arith.constant 0 : index
    %26 = vector.load %arg2[%c0_17, %c0_18] : memref<128x2xf32, #tpu.memory_space<vmem>>, vector<128x1xf32>
    %c0_19 = arith.constant 0 : index
    %c1 = arith.constant 1 : index
    %27 = vector.load %arg2[%c0_19, %c1] : memref<128x2xf32, #tpu.memory_space<vmem>>, vector<128x1xf32>
    %c0_20 = arith.constant 0 : index
    %c0_21 = arith.constant 0 : index
    %28 = vector.load %arg9[%c0_20, %c0_21] : memref<1x384xi32, #tpu.memory_space<vmem>>, vector<1x384xi32>
    %c0_i32 = arith.constant 0 : i32
    %29 = vector.broadcast %c0_i32 : i32 to vector<1x384xi32>
    %30 = arith.cmpi eq, %28, %29 : vector<1x384xi32>
    %31 = vector.broadcast %26 : vector<128x1xf32> to vector<128x384xf32>
    %32 = arith.addf %24, %31 : vector<128x384xf32>
    %cst_22 = arith.constant 5.200000e+01 : f32
    %33 = vector.broadcast %cst_22 : f32 to vector<128x384xf32>
    %34 = arith.mulf %32, %33 : vector<128x384xf32>
    %c1_i32 = arith.constant 1 : i32
    %35 = vector.broadcast %c1_i32 : i32 to vector<1x384xi32>
    %36 = arith.cmpi eq, %28, %35 : vector<1x384xi32>
    %37 = vector.broadcast %27 : vector<128x1xf32> to vector<128x384xf32>
    %38 = arith.addf %24, %37 : vector<128x384xf32>
    %cst_23 = arith.constant 5.200000e+01 : f32
    %39 = vector.broadcast %cst_23 : f32 to vector<128x384xf32>
    %40 = arith.mulf %38, %39 : vector<128x384xf32>
    %c2_i32 = arith.constant 2 : i32
    %41 = vector.broadcast %c2_i32 : i32 to vector<1x384xi32>
    %42 = arith.cmpi eq, %28, %41 : vector<1x384xi32>
    %c0_24 = arith.constant 0 : index
    %c0_25 = arith.constant 0 : index
    %43 = vector.load %arg10[%c0_24, %c0_25] : memref<1x384xf32, #tpu.memory_space<vmem>>, vector<1x384xf32>
    %44 = vector.broadcast %43 : vector<1x384xf32> to vector<128x384xf32>
    %45 = arith.mulf %25, %44 : vector<128x384xf32>
    %c3_i32 = arith.constant 3 : i32
    %46 = vector.broadcast %c3_i32 : i32 to vector<1x384xi32>
    %47 = arith.cmpi eq, %28, %46 : vector<1x384xi32>
    %c0_26 = arith.constant 0 : index
    %c0_27 = arith.constant 0 : index
    %48 = vector.load %arg11[%c0_26, %c0_27] : memref<1x384xf32, #tpu.memory_space<vmem>>, vector<1x384xf32>
    %49 = vector.broadcast %48 : vector<1x384xf32> to vector<128x384xf32>
    %50 = arith.mulf %25, %49 : vector<128x384xf32>
    %51 = vector.shape_cast %47 : vector<1x384xi1> to vector<1x384xi1>
    %52 = vector.broadcast %51 : vector<1x384xi1> to vector<128x384xi1>
    %53 = arith.select %52, %50, %24 : vector<128x384xi1>, vector<128x384xf32>
    %54 = vector.shape_cast %42 : vector<1x384xi1> to vector<1x384xi1>
    %55 = vector.broadcast %54 : vector<1x384xi1> to vector<128x384xi1>
    %56 = arith.select %55, %45, %53 : vector<128x384xi1>, vector<128x384xf32>
    %57 = vector.shape_cast %36 : vector<1x384xi1> to vector<1x384xi1>
    %58 = vector.broadcast %57 : vector<1x384xi1> to vector<128x384xi1>
    %59 = arith.select %58, %40, %56 : vector<128x384xi1>, vector<128x384xf32>
    %60 = vector.shape_cast %30 : vector<1x384xi1> to vector<1x384xi1>
    %61 = vector.broadcast %60 : vector<1x384xi1> to vector<128x384xi1>
    %62 = arith.select %61, %34, %59 : vector<128x384xi1>, vector<128x384xf32>
    %c0_28 = arith.constant 0 : index
    %c0_29 = arith.constant 0 : index
    %63 = vector.load %arg12[%c0_28, %c0_29] : memref<128x384xf32, #tpu.memory_space<vmem>>, vector<128x384xf32>
    tpu.vector_store %arg12[%c0_28, %c0_29], %62 {strides = array<i32>} : memref<128x384xf32, #tpu.memory_space<vmem>>, vector<128x384xf32>,
    return
  }
  func.func @transform_0(%arg0: i32) -> (i32, i32) {
    %c0_i32 = arith.constant 0 : i32
    %c0_i32_0 = arith.constant 0 : i32
    return %arg0, %c0_i32 : i32, i32
  }
  func.func @transform_1(%arg0: i32) -> (i32, i32) {
    %c0_i32 = arith.constant 0 : i32
    %c0_i32_0 = arith.constant 0 : i32
    return %arg0, %c0_i32 : i32, i32
  }
  func.func @transform_2(%arg0: i32) -> (i32, i32) {
    %c0_i32 = arith.constant 0 : i32
    %c0_i32_0 = arith.constant 0 : i32
    %c0_i32_1 = arith.constant 0 : i32
    return %c0_i32, %c0_i32_0 : i32, i32
  }
  func.func @transform_3(%arg0: i32) -> (i32, i32) {
    %c0_i32 = arith.constant 0 : i32
    %c0_i32_0 = arith.constant 0 : i32
    %c0_i32_1 = arith.constant 0 : i32
    return %c0_i32, %c0_i32_0 : i32, i32
  }
  func.func @transform_4(%arg0: i32) -> (i32, i32) {
    %c0_i32 = arith.constant 0 : i32
    %c0_i32_0 = arith.constant 0 : i32
    %c0_i32_1 = arith.constant 0 : i32
    return %c0_i32, %c0_i32_0 : i32, i32
  }
  func.func @transform_5(%arg0: i32) -> (i32, i32) {
    %c0_i32 = arith.constant 0 : i32
    %c0_i32_0 = arith.constant 0 : i32
    %c0_i32_1 = arith.constant 0 : i32
    return %c0_i32, %c0_i32_0 : i32, i32
  }
  func.func @transform_6(%arg0: i32) -> (i32, i32) {
    %c0_i32 = arith.constant 0 : i32
    %c0_i32_0 = arith.constant 0 : i32
    %c0_i32_1 = arith.constant 0 : i32
    return %c0_i32, %c0_i32_0 : i32, i32
  }
  func.func @transform_7(%arg0: i32) -> (i32, i32) {
    %c0_i32 = arith.constant 0 : i32
    %c0_i32_0 = arith.constant 0 : i32
    %c0_i32_1 = arith.constant 0 : i32
    return %c0_i32, %c0_i32_0 : i32, i32
  }
  func.func @transform_8(%arg0: i32) -> (i32, i32) {
    %c0_i32 = arith.constant 0 : i32
    %c0_i32_0 = arith.constant 0 : i32
    %c0_i32_1 = arith.constant 0 : i32
    return %c0_i32, %c0_i32_0 : i32, i32
  }
  func.func @transform_9(%arg0: i32) -> (i32, i32) {
    %c0_i32 = arith.constant 0 : i32
    %c0_i32_0 = arith.constant 0 : i32
    %c0_i32_1 = arith.constant 0 : i32
    return %c0_i32, %c0_i32_0 : i32, i32
  }
  func.func @transform_10(%arg0: i32) -> (i32, i32) {
    %c0_i32 = arith.constant 0 : i32
    %c0_i32_0 = arith.constant 0 : i32
    %c0_i32_1 = arith.constant 0 : i32
    return %c0_i32, %c0_i32_0 : i32, i32
  }
  func.func @transform_11(%arg0: i32) -> (i32, i32) {
    %c0_i32 = arith.constant 0 : i32
    %c0_i32_0 = arith.constant 0 : i32
    return %arg0, %c0_i32 : i32, i32
  }
}

</mosaic_0001>

<bundles_post_ra>
// kernel: _forward_impl.1
= control target key start
LH: loop header
LB: loop body
LE: loop exit
PB: predicated region body
PF: predicated region fallthrough
CT: control target
= control target key end

     0   :  { %vm128_vm0 = vcmask 1041408   ;;  %vm103_vm1 = vcmask 31744   ;;  %vm292_vm2 = vcmask 523264   ;;  %vm559_vm3 = vcmask 785408   ;;  %s4376_s2 = inlined_call_operand.vmem [shape: bf16[4,64], index: 2, kind: input, shape index: {}]   ;;  %s4377_s0 = inlined_call_operand.vmem [shape: bf16[128,4], index: 0, kind: input, shape index: {}]   ;;  %s4378_s4 = inlined_call_operand.vmem [shape: bf16[64,96], index: 4, kind: input, shape index: {}]   ;;  %s4379_s6 = inlined_call_operand.vmem [shape: bf16[96,384], index: 6, kind: input, shape index: {}]   ;;  %s4380_s3 = inlined_call_operand.vmem [shape: f32[1,64], index: 3, kind: input, shape index: {}]   ;;  %s4381_s1 = inlined_call_operand.vmem [shape: f32[128,2], index: 1, kind: input, shape index: {}]   ;;  %s4382_s5 = inlined_call_operand.vmem [shape: f32[1,96], index: 5, kind: input, shape index: {}]   ;;  %s4383_s8 = inlined_call_operand.vmem [shape: s32[1,384], index: 8, kind: input, shape index: {}]   ;;  %s4384_s7 = inlined_call_operand.vmem [shape: f32[1,384], index: 7, kind: input, shape index: {}]   ;;  %s4385_s10 = inlined_call_operand.vmem [shape: f32[1,384], index: 10, kind: input, shape index: {}]   ;;  %s4386_s9 = inlined_call_operand.vmem [shape: f32[1,384], index: 9, kind: input, shape index: {}]   ;;  %s4387_s11 = inlined_call_operand.vmem [shape: f32[128,384], index: 11, kind: output, shape index: {}]  }
   0x1   :  { %v55_v0 = vld [vmem:[%s4376_s2] sm:$0x3]  ;;  %v2202_v3 = vld [vmem:[%s4377_s0 + $0x8] sm:$0xff]   ;;  %v2203_v4 = vld [vmem:[%s4377_s0 + $0x10] sm:$0xff]  }
   0x2   :  { %2192 = vmatprep.subr.msk.bf16.mxu0 %vm128_vm0, %v55_v0  ;;  %v130_v1 = vsel %vm128_vm0, %v55_v0, 0  ;;  %v2201_v2 = vld [vmem:[%s4377_s0] sm:$0xff]   ;;  %2193 = vmatprep.subr.msk.bf16.mxu1 %vm128_vm0, %v55_v0  ;;  %v2204_v5 = vld [vmem:[%s4377_s0 + $0x18] sm:$0xff]   ;;  %v2207_v6 = vld [vmem:[%s4377_s0 + $0x30] sm:$0xff]  }
   0x3   :  { %2121 = vmatpush3.bf16.msra.mxu0 %v130_v1  ;;  %2191 = vmatpush3.bf16.msra.mxu1 %v130_v1  ;;  %v2205_v7 = vld [vmem:[%s4377_s0 + $0x20] sm:$0xff]   ;;  %v2208_v8 = vld [vmem:[%s4377_s0 + $0x38] sm:$0xff]   ;;  %v2206_v10 = vld [vmem:[%s4377_s0 + $0x28] sm:$0xff]  }
   0x4   :  { %2122 = vmatprep.mubr.msk.bf16.mxu0 %vm103_vm1, %v2201_v2  ;;  %2134 = vmatprep.mubr.msk.bf16.mxu1 %vm103_vm1, %v2207_v6  ;;  %v2209_v9 = vld [vmem:[%s4378_s4 + $0x18] sm:$0xff]   ;;  %v2210_v11 = vld [vmem:[%s4378_s4 + $0x10] sm:$0xff]   ;;  %v2211_v12 = vld [vmem:[%s4378_s4 + $0x8] sm:$0xff]  }
   0x5   :  { %2138 = vmatprep.subr.bf16.mxu1 %v2209_v9  ;;  %v2212_v13 = vld [vmem:[%s4378_s4] sm:$0xff]   ;;  %v2215_v15 = vld [vmem:[%s4379_s6 + $0x7c] ss:$12 sps:$4 sm:$0xff]   ;;  %v2223_v19 = vld [vmem:[%s4379_s6 + $0x4c] ss:$12 sps:$4 sm:$0xff]  }
   0x6   :  { %2123 = vmatmul.mubr.msk.bf16.vlgmr.msra.gmra.mxu0 %vm103_vm1, %v2202_v3  ;;  %2135 = vmatmul.mubr.msk.bf16.vlgmr.msra.gmra.mxu1 %vm103_vm1, %v2208_v8  ;;  %v2213_v14 = vld [vmem:[%s4379_s6 + $0x78] ss:$12 sps:$4 sm:$0xff]   ;;  %v2216_v16 = vld [vmem:[%s4379_s6 + $0x80] ss:$12 sps:$4 sm:$0xff]   ;;  %v2221_v20 = vld [vmem:[%s4379_s6 + $0x48] ss:$12 sps:$4 sm:$0xff]  }
   0x7   :  { %2126 = vmatprep.mubr.msk.bf16.mxu0 %vm103_vm1, %v2203_v4  ;;  %2139 = vmatpush3.bf16.msra.mxu1 %v2209_v9  ;;  %v2219_v17 = vld [vmem:[%s4379_s6 + $0x64] ss:$12 sps:$4 sm:$0xff]   ;;  %v2217_v18 = vld [vmem:[%s4379_s6 + $0x60] ss:$12 sps:$4 sm:$0xff]   ;;  %v2220_v46 = vld [vmem:[%s4379_s6 + $0x68] ss:$12 sps:$4 sm:$0xff]  }
   0x8   :  { %2140 = vmatprep.subr.bf16.mxu1 %v2210_v11  ;;  %588 = vmatprep.subr.bf16.mxu0 %v2215_v15  ;;  %v2227_v21 = vld [vmem:[%s4379_s6 + $0x34] ss:$12 sps:$4 sm:$0xff]   ;;  %v2225_v22 = vld [vmem:[%s4379_s6 + $0x30] ss:$12 sps:$4 sm:$0xff]  }
   0x9   :  { %589 = vmatpush1.bf16.msra.mxu0 %v2213_v14  ;;  %v1973_v25 = vld [vmem:[%s4380_s3] ss:$0 sm:$0xff]  ;;  %v2224_v55 = vld [vmem:[%s4379_s6 + $0x50] ss:$12 sps:$4 sm:$0xff]  }
   0xa   :  { %590 = vmatprep.subr.bf16.mxu0 %v2219_v17 }
   0xb   :  { %2141 = vmatpush3.bf16.msra.mxu1 %v2210_v11 }
   0xc   :  { %2142 = vmatprep.subr.bf16.mxu1 %v2211_v12 }
   0xd   :  { %591 = vmatpush1.bf16.msra.mxu0 %v2217_v18  ;;  %v2228_v18 = vld [vmem:[%s4379_s6 + $0x38] ss:$12 sps:$4 sm:$0xff]  }
   0xe   :  { %2127 = vmatmul.mubr.msk.bf16.gmra.mxu0 %vm103_vm1, %v2204_v5  ;;  %592 = vmatprep.subr.bf16.mxu0 %v2223_v19  ;;  %v2231_v19 = vld [vmem:[%s4379_s6 + $0x1c] ss:$12 sps:$4 sm:$0xff]  }
   0xf   :  { %2130 = vmatprep.mubr.msk.bf16.mxu0 %vm103_vm1, %v2205_v7  ;;  %2143 = vmatpush3.bf16.msra.mxu1 %v2211_v12 }
  0x10   :  { %2144 = vmatprep.subr.bf16.mxu1 %v2212_v13 }
  0x11   :  { %593 = vmatpush1.bf16.msra.mxu0 %v2221_v20  ;;  %v2229_v20 = vld [vmem:[%s4379_s6 + $0x18] ss:$12 sps:$4 sm:$0xff]  }
  0x12   :  { %594 = vmatprep.subr.bf16.mxu0 %v2227_v21  ;;  %v2232_v21 = vld [vmem:[%s4379_s6 + $0x20] ss:$12 sps:$4 sm:$0xff]  }
  0x13   :  { %2145 = vmatpush3.bf16.msra.mxu1 %v2212_v13 }
  0x14   :  { %2162 = vmatprep.subr.bf16.mxu1 %v2216_v16 }
  0x15   :  { %595 = vmatpush1.bf16.msra.mxu0 %v2225_v22  ;;  %v2235_v22 = vld [vmem:[%s4379_s6 + $0x4] ss:$12 sps:$4 sm:$0xff]  }
  0x16   :  { %2131 = vmatmul.mubr.msk.bf16.gmra.mxu0 %vm103_vm1, %v2206_v10  ;;  %596 = vmatprep.subr.bf16.mxu0 %v2231_v19 }
  0x19   :  { %597 = vmatpush1.bf16.msra.mxu0 %v2229_v20  ;;  %v448_v20 = vlaneseq }
  0x1a   :  { %598 = vmatprep.subr.bf16.mxu0 %v2235_v22  ;;  %v1194_v22 = vld [vmem:[%s4383_s8] sm:$0x7] }
  0x1b   :  { %vm1599_vm4 = vcmp.eq.s32.totalorder %v1194_v22, 3  ;;  %vm1372_vm5 = vcmp.eq.s32.totalorder %v1194_v22, 1  ;;  %vm1533_vm6 = vcmp.eq.s32.totalorder %v1194_v22, 2  ;;  %vm1195_vm7 = vcmp.eq.s32.totalorder %v1194_v22, 0 }
  0xc6   :  { %v2124_v23 = vpop.f32.mrf.mxu0  ;;  %v2136_v29 = vpop.f32.mrf.mxu1 }
  0xc7   :  { %v175_v30 = vadd.f32 %v2124_v23, %v1973_v25  ;;  %v223_v11 = vadd.f32 %v2136_v29, %v1973_v25  ;;  %v2233_v23 = vld [vmem:[%s4379_s6] ss:$12 sps:$4 sm:$0xff]   ;;  %v1181_v29 = vld [vmem:[%s4381_s1 + $0x18] sm:$0xff] }
  0xc8   :  { %v166_v24 = vpop.f32.mrf.mxu0  ;;  %v214_v35 = vpop.f32.mrf.mxu1  ;;  %599 = vmatpush1.bf16.msra.mxu0 %v2233_v23 }
  0xc9   :  { %v167_v27 = vadd.f32 %v1973_v25, %v166_v24  ;;  %v231_v38 = vmax.f32 %v175_v30, 0.0  ;;  %v215_v60 = vadd.f32 %v1973_v25, %v214_v35  ;;  %v243_v15 = vmax.f32 %v223_v11, 0.0  ;;  %v2236_v24 = vld [vmem:[%s4379_s6 + $0x8] ss:$12 sps:$4 sm:$0xff]   ;;  %v1182_v30 = vld [vmem:[%s4381_s1 + $0x20] sm:$0xff] }
  0xca   :  { %v2125_v26 = vpop.f32.mrf.mxu0  ;;  %v2137_v45 = vpop.f32.mrf.mxu1  ;;  %v1187_v35 = vld [vmem:[%s4381_s1 + $0x48] sm:$0xff] }
  0xcb   :  { %v178_v28 = vadd.f32 %v2125_v26, %v1973_v25  ;;  %v229_v36 = vmax.f32 %v167_v27, 0.0  ;;  %v241_v4 = vmax.f32 %v215_v60, 0.0  ;;  %v226_v12 = vadd.f32 %v2137_v45, %v1973_v25  ;;  %v1180_v27 = vld [vmem:[%s4381_s1 + $0x10] sm:$0xff] }
  0xcc   :  { %v169_v31 = vpop.f32.mrf.mxu0  ;;  %v217_v54 = vpop.f32.mrf.mxu1  ;;  %v2526_v26 = vmov 1  }
  0xcd   :  { %v170_v32 = vadd.f32 %v1973_v25, %v169_v31  ;;  %v232_v33 = vmax.f32 %v178_v28, 0.0  ;;  %v218_v63 = vadd.f32 %v1973_v25, %v217_v54  ;;  %2198 = vset.pattern.permute.xlu0 %v2526_v26  ;;  %v1179_v28 = vld [vmem:[%s4381_s1 + $0x8] sm:$0xff] }
  0xce   :  { %v2128_v34 = vpop.f32.mrf.mxu0  ;;  %1378 = vperm.xlu0 %2198, %v1179_v28   ;;  %v1183_v31 = vld [vmem:[%s4381_s1 + $0x28] sm:$0xff] }
  0xcf   :  { %v230_v37 = vmax.f32 %v170_v32, 0.0  ;;  %v191_v39 = vadd.f32 %v2128_v34, %v1973_v25  ;;  %v246_v43 = vpack.c.bf16 %v232_v33, %v231_v38  ;;  %v242_v8 = vmax.f32 %v218_v63, 0.0  ;;  %v1184_v32 = vld [vmem:[%s4381_s1 + $0x30] sm:$0xff]  ;;  %v1185_v33 = vld [vmem:[%s4381_s1 + $0x38] sm:$0xff]  ;;  %v1186_v34 = vld [vmem:[%s4381_s1 + $0x40] sm:$0xff] }
  0xd0   :  { %v182_v40 = vpop.f32.mrf.mxu0  ;;  %v1190_v38 = vld [vmem:[%s4381_s1 + $0x60] sm:$0xff] }
  0xd1   :  { %v245_v41 = vpack.c.bf16 %v230_v37, %v229_v36  ;;  %v183_v42 = vadd.f32 %v1973_v25, %v182_v40  ;;  %v235_v48 = vmax.f32 %v191_v39, 0.0  ;;  %v251_v14 = vpack.c.bf16 %v242_v8, %v241_v4  ;;  %v1188_v36 = vld [vmem:[%s4381_s1 + $0x50] sm:$0xff]  ;;  %v1189_v37 = vld [vmem:[%s4381_s1 + $0x58] sm:$0xff]  ;;  %v1191_v39 = vld [vmem:[%s4381_s1 + $0x68] sm:$0xff] }
  0xd2   :  { %v2129_v44 = vpop.f32.mrf.mxu0  ;;  %1390 = vperm.xlu0 %2198, %v1182_v30   ;;  %v1192_v40 = vld [vmem:[%s4381_s1 + $0x70] sm:$0xff] }
  0xd3   :  { %v194_v47 = vadd.f32 %v2129_v44, %v1973_v25  ;;  %2146 = vmatprep.mubr.msk.bf16.mxu1 %vm292_vm2, %v245_v41  ;;  %v233_v50 = vmax.f32 %v183_v42, 0.0  ;;  %v1178_v41 = vld [vmem:[%s4381_s1] sm:$0xff]  ;;  %v1193_v42 = vld [vmem:[%s4381_s1 + $0x78] sm:$0xff] }
  0xd4   :  { %v185_v49 = vpop.f32.mrf.mxu0  ;;  %2147 = vmatmul.mubr.msk.bf16.vlgmr.msra.gmra.mxu1 %vm292_vm2, %v246_v43 }
  0xd5   :  { %v236_v51 = vmax.f32 %v194_v47, 0.0  ;;  %v186_v52 = vadd.f32 %v1973_v25, %v185_v49  ;;  %2163 = vmatpush3.bf16.msra.mxu1 %v2216_v16  ;;  %v244_v16 = vmax.f32 %v226_v12, 0.0 }
  0xd6   :  { %v2132_v53 = vpop.f32.mrf.mxu0  ;;  %2164 = vmatprep.subr.bf16.mxu1 %v2220_v46  ;;  %1398 = vperm.xlu0 %2198, %v1184_v32  }
  0xd7   :  { %v234_v56 = vmax.f32 %v186_v52, 0.0  ;;  %v248_v57 = vpack.c.bf16 %v236_v51, %v235_v48  ;;  %v207_v58 = vadd.f32 %v2132_v53, %v1973_v25  ;;  %v252_v17 = vpack.c.bf16 %v244_v16, %v243_v15 }
  0xd8   :  { %v198_v59 = vpop.f32.mrf.mxu0 }
  0xd9   :  { %v247_v61 = vpack.c.bf16 %v234_v56, %v233_v50  ;;  %v199_v62 = vadd.f32 %v1973_v25, %v198_v59  ;;  %2165 = vmatpush3.bf16.msra.mxu1 %v2220_v46  ;;  %v239_v2 = vmax.f32 %v207_v58, 0.0  ;;  %v1990_v46 = vld [vmem:[%s4382_s5] ss:$0 sm:$0xff] }
  0xda   :  { %v2133_v0 = vpop.f32.mrf.mxu0  ;;  %2166 = vmatprep.subr.bf16.mxu1 %v2224_v55  ;;  %1406 = vperm.xlu0 %2198, %v1186_v34  }
  0xdb   :  { %v210_v1 = vadd.f32 %v2133_v0, %v1973_v25  ;;  %2150 = vmatprep.mubr.msk.bf16.mxu1 %vm292_vm2, %v247_v61  ;;  %v237_v5 = vmax.f32 %v199_v62, 0.0 }
  0xdc   :  { %v201_v3 = vpop.f32.mrf.mxu0  ;;  %2151 = vmatmul.mubr.msk.bf16.gmra.mxu1 %vm292_vm2, %v248_v57 }
  0xdd   :  { %v240_v6 = vmax.f32 %v210_v1, 0.0  ;;  %v202_v7 = vadd.f32 %v1973_v25, %v201_v3  ;;  %2167 = vmatpush3.bf16.msra.mxu1 %v2224_v55  ;;  %v2525_v25 = vmov 0  }
  0xde   :  { %2168 = vmatprep.subr.bf16.mxu1 %v2228_v18  ;;  %616 = vmatprep.mubr.bf16.mxu0 %v2525_v25 }
  0xdf   :  { %v238_v9 = vmax.f32 %v202_v7, 0.0  ;;  %v250_v10 = vpack.c.bf16 %v240_v6, %v239_v2  ;;  %2196 = vset.pattern.permute.xlu1 %v2525_v25  ;;  %1414 = vperm.xlu0 %2198, %v1188_v36  }
  0xe0   :  { %1208 = vperm.xlu1 %2196, %v1180_v27  }
  0xe1   :  { %v249_v13 = vpack.c.bf16 %v238_v9, %v237_v5  ;;  %2169 = vmatpush3.bf16.msra.mxu1 %v2228_v18 }
  0xe2   :  { %2170 = vmatprep.subr.bf16.mxu1 %v2232_v21 }
  0xe3   :  { %2154 = vmatprep.mubr.msk.bf16.mxu1 %vm292_vm2, %v249_v13  ;;  %1422 = vperm.xlu0 %2198, %v1190_v38  }
  0xe4   :  { %2155 = vmatmul.mubr.msk.bf16.gmra.mxu1 %vm292_vm2, %v250_v10  ;;  %1213 = vperm.xlu1 %2196, %v1181_v29  }
  0xe5   :  { %2158 = vmatprep.mubr.msk.bf16.mxu1 %vm292_vm2, %v251_v14  ;;  %2171 = vmatpush3.bf16.msra.mxu1 %v2232_v21  ;;  %v449_v21 = vshrl.u32 %v448_v20, 7 }
  0xe6   :  { %2172 = vmatprep.subr.bf16.mxu1 %v2236_v24 }
  0xe7   :  { %1430 = vperm.xlu0 %2198, %v1192_v40   ;;  %v2779_v23 = vsub.s32 0, %v449_v21 }
  0xe8   :  { %1223 = vperm.xlu1 %2196, %v1183_v31  }
  0xe9   :  { %2173 = vmatpush3.bf16.msra.mxu1 %v2236_v24  ;;  %v446_v24 = vld [vmem:[%s4384_s7] sm:$0x7] }
  0xeb   :  { %2199 = vset.pattern.permute.xlu0 %v2525_v25 }
  0xec   :  { %2159 = vmatmul.mubr.msk.bf16.gmra.mxu1 %vm292_vm2, %v252_v17  ;;  %1233 = vperm.xlu1 %2196, %v1185_v33  }
  0xed   :  { %1198 = vperm.xlu0 %2199, %v1178_v41  }
  0xf0   :  { %1243 = vperm.xlu1 %2196, %v1187_v35  }
  0xf1   :  { %1203 = vperm.xlu0 %2199, %v1179_v28   ;;  %v2789_v28 = vrot.slane %v446_v24, %v2779_v23 }
  0xf4   :  { %1253 = vperm.xlu1 %2196, %v1189_v37  }
  0xf5   :  { %1218 = vperm.xlu0 %2199, %v1182_v30   ;;  %v1534_v30 = vld [vmem:[%s4386_s9] sm:$0x7] }
  0xf8   :  { %1263 = vperm.xlu1 %2196, %v1191_v39  }
  0xf9   :  { %1228 = vperm.xlu0 %2199, %v1184_v32  }
  0xfc   :  { %2197 = vset.pattern.permute.xlu1 %v2526_v26 }
  0xfd   :  { %1374 = vperm.xlu1 %2197, %v1178_v41   ;;  %1238 = vperm.xlu0 %2199, %v1186_v34  }
 0x101   :  { %1382 = vperm.xlu1 %2197, %v1180_v27   ;;  %1248 = vperm.xlu0 %2199, %v1188_v36   ;;  %v2786_v27 = vsub.s32 1, %v449_v21  ;;  %v2812_v36 = vsel %vm1372_vm5, 1, %v2525_v25 }
 0x103   :  { %v2806_v34 = vrot.slane %v446_v24, %v2786_v27 }
 0x105   :  { %1386 = vperm.xlu1 %2197, %v1181_v29   ;;  %1258 = vperm.xlu0 %2199, %v1190_v38   ;;  %v1600_v29 = vld [vmem:[%s4385_s10] sm:$0x7] }
 0x106   :  { %v2815_v38 = vrot.slane %v1600_v29, %v2779_v23 }
 0x109   :  { %1394 = vperm.xlu1 %2197, %v1183_v31   ;;  %1268 = vperm.xlu0 %2199, %v1192_v40   ;;  %v2821_v40 = vrot.slane %v1600_v29, %v2786_v27 }
 0x10d   :  { %1402 = vperm.xlu1 %2197, %v1185_v33   ;;  %1273 = vperm.xlu0 %2199, %v1193_v42   ;;  %v2803_v33 = vsel %vm1599_vm4, 1, %v2525_v25 }
 0x111   :  { %1410 = vperm.xlu1 %2197, %v1187_v35   ;;  %2200 = vset.pattern.permute.xlu0 %v2526_v26  ;;  %v2784_v26 = vsub.s32 2, %v449_v21  ;;  %v2809_v35 = vsel %vm1533_vm6, 1, %v2525_v25 }
 0x113   :  { %v2798_v31 = vrot.slane %v446_v24, %v2784_v26 }
 0x115   :  { %1418 = vperm.xlu1 %2197, %v1189_v37  }
 0x119   :  { %1426 = vperm.xlu1 %2197, %v1191_v39   ;;  %v2818_v39 = vrot.slane %v1600_v29, %v2784_v26 }
 0x11b   :  { %4440 = vst [vmem:[#allocation3_spill] sm:$0xff] %v2818_v39 }
 0x11d   :  { %1434 = vperm.xlu1 %2197, %v1193_v42   ;;  %v2826_v42 = vrot.slane %v1534_v30, %v2779_v23 }
 0x149   :  { %v2800_v32 = vpop.permute.xlu0 %1378 }
 0x14a   :  { %4439 = vst [vmem:[#allocation2_spill] sm:$0xff] %v2800_v32 }
 0x15b   :  { %v2823_v41 = vpop.permute.xlu1 %1208 }
 0x15c   :  { %4441 = vst [vmem:[#allocation4_spill] sm:$0xff] %v2823_v41 }
 0x194   :  { %v2148_v43 = vpop.f32.mrf.mxu1 }
 0x195   :  { %v360_v51 = vadd.f32 %v2148_v43, %v1990_v46 }
 0x196   :  { %v351_v44 = vpop.f32.mrf.mxu1 }
 0x197   :  { %v352_v49 = vadd.f32 %v1990_v46, %v351_v44 }
 0x198   :  { %v2149_v45 = vpop.f32.mrf.mxu1 }
 0x199   :  { %v363_v47 = vadd.f32 %v2149_v45, %v1990_v46  ;;  %v2830_v45 = vrot.slane %v1534_v30, %v2786_v27 }
 0x19a   :  { %v354_v48 = vpop.f32.mrf.mxu1 }
 0x19b   :  { %v355_v50 = vadd.f32 %v1990_v46, %v354_v48  ;;  %v415_v54 = vpack.c.bf16 %v363_v47, %v360_v51 }
 0x19c   :  { %v2152_v52 = vpop.f32.mrf.mxu1 }
 0x19d   :  { %v414_v53 = vpack.c.bf16 %v355_v50, %v352_v49  ;;  %v376_v61 = vadd.f32 %v2152_v52, %v1990_v46 }
 0x19e   :  { %v367_v55 = vpop.f32.mrf.mxu1 }
 0x19f   :  { %2021 = vmatmul.mubr.msk.bf16.vlgmr.msra.gmra.mxu0 %vm559_vm3, %v414_v53  ;;  %2174 = vmatprep.mubr.msk.bf16.mxu1 %vm559_vm3, %v414_v53  ;;  %v368_v59 = vadd.f32 %v1990_v46, %v367_v55 }
 0x1a0   :  { %v2153_v56 = vpop.f32.mrf.mxu1  ;;  %2175 = vmatmul.mubr.msk.bf16.vlgmr.msra.gmra.mxu1 %vm559_vm3, %v415_v54  ;;  %626 = vmatprep.mubr.bf16.mxu0 %v2525_v25 }
 0x1a1   :  { %v379_v57 = vadd.f32 %v2153_v56, %v1990_v46 }
 0x1a2   :  { %v370_v58 = vpop.f32.mrf.mxu1 }
 0x1a3   :  { %v371_v60 = vadd.f32 %v1990_v46, %v370_v58  ;;  %v417_v0 = vpack.c.bf16 %v379_v57, %v376_v61  ;;  %v2846_v61 = vpop.permute.xlu0 %1390 }
 0x1a4   :  { %v2156_v62 = vpop.f32.mrf.mxu1  ;;  %4442 = vst [vmem:[#allocation5_spill] sm:$0xff] %v2846_v61 }
 0x1a5   :  { %v416_v63 = vpack.c.bf16 %v371_v60, %v368_v59  ;;  %v392_v2 = vadd.f32 %v2156_v62, %v1990_v46 }
 0x1a6   :  { %v383_v1 = vpop.f32.mrf.mxu1 }
 0x1a7   :  { %2022 = vmatmul.mubr.msk.bf16.gmra.mxu0 %vm559_vm3, %v415_v54  ;;  %2178 = vmatprep.mubr.msk.bf16.mxu1 %vm559_vm3, %v416_v63  ;;  %v384_v4 = vadd.f32 %v1990_v46, %v383_v1  ;;  %v2871_v22 = vpop.permute.xlu0 %1398 }
 0x1a8   :  { %v2157_v3 = vpop.f32.mrf.mxu1  ;;  %2179 = vmatmul.mubr.msk.bf16.gmra.mxu1 %vm559_vm3, %v417_v0  ;;  %636 = vmatprep.mubr.bf16.mxu0 %v2525_v25  ;;  %4444 = vst [vmem:[#allocation7_spill] sm:$0xff] %v2871_v22 }
 0x1a9   :  { %v395_v5 = vadd.f32 %v2157_v3, %v1990_v46 }
 0x1aa   :  { %v386_v6 = vpop.f32.mrf.mxu1 }
 0x1ab   :  { %v387_v7 = vadd.f32 %v1990_v46, %v386_v6  ;;  %v419_v8 = vpack.c.bf16 %v395_v5, %v392_v2  ;;  %v2853_v2 = vsel %vm1195_vm7, 1, %v2525_v25  ;;  %v2855_v5 = vpop.permute.xlu1 %1213 }
 0x1ac   :  { %v2160_v9 = vpop.f32.mrf.mxu1  ;;  %4443 = vst [vmem:[#allocation6_spill] sm:$0xff] %v2855_v5 }
 0x1ad   :  { %v418_v10 = vpack.c.bf16 %v387_v7, %v384_v4  ;;  %v408_v12 = vadd.f32 %v2160_v9, %v1990_v46 }
 0x1ae   :  { %v399_v11 = vpop.f32.mrf.mxu1 }
 0x1af   :  { %2023 = vmatmul.mubr.msk.bf16.gmra.mxu0 %vm559_vm3, %v416_v63  ;;  %2182 = vmatprep.mubr.msk.bf16.mxu1 %vm559_vm3, %v418_v10  ;;  %v400_v14 = vadd.f32 %v1990_v46, %v399_v11 }
 0x1b0   :  { %v2161_v13 = vpop.f32.mrf.mxu1  ;;  %2183 = vmatmul.mubr.msk.bf16.gmra.mxu1 %vm559_vm3, %v419_v8  ;;  %646 = vmatprep.mubr.bf16.mxu0 %v2525_v25 }
 0x1b1   :  { %v411_v15 = vadd.f32 %v2161_v13, %v1990_v46 }
 0x1b2   :  { %v402_v16 = vpop.f32.mrf.mxu1 }
 0x1b3   :  { %v403_v17 = vadd.f32 %v1990_v46, %v402_v16  ;;  %v421_v18 = vpack.c.bf16 %v411_v15, %v408_v12  ;;  %v2833_v46 = vrot.slane %v1534_v30, %v2784_v26 }
 0x1b5   :  { %v420_v19 = vpack.c.bf16 %v403_v17, %v400_v14 }
 0x1b7   :  { %2024 = vmatmul.mubr.msk.bf16.gmra.mxu0 %vm559_vm3, %v417_v0  ;;  %2186 = vmatprep.mubr.msk.bf16.mxu1 %vm559_vm3, %v420_v19 }
 0x1b8   :  { %2187 = vmatmul.mubr.msk.bf16.gmra.mxu1 %vm559_vm3, %v421_v18  ;;  %656 = vmatprep.mubr.bf16.mxu0 %v2525_v25 }
 0x1bf   :  { %2025 = vmatmul.mubr.msk.bf16.gmra.mxu0 %vm559_vm3, %v418_v10 }
 0x1c0   :  { %666 = vmatprep.mubr.bf16.mxu0 %v2525_v25 }
 0x1c7   :  { %2026 = vmatmul.mubr.msk.bf16.gmra.mxu0 %vm559_vm3, %v419_v8 }
 0x1c8   :  { %676 = vmatprep.mubr.bf16.mxu0 %v2525_v25 }
 0x1cf   :  { %2027 = vmatmul.mubr.msk.bf16.gmra.mxu0 %vm559_vm3, %v420_v19 }
 0x1d0   :  { %686 = vmatprep.mubr.bf16.mxu0 %v2525_v25 }
 0x1d7   :  { %2028 = vmatmul.mubr.msk.bf16.gmra.mxu0 %vm559_vm3, %v421_v18 }
 0x25f   :  { %v618_v37 = vpop.f32.mrf.mxu0 }
 0x260   :  { %v619_v43 = vadd.f32 %v618_v37, %v2789_v28  ;;  %v2176_v44 = vpop.f32.mrf.mxu1 }
 0x261   :  { %v740_v48 = vadd.f32 %v2176_v44, %v2798_v31  ;;  %v620_v49 = vpop.f32.mrf.mxu0 }
 0x262   :  { %v2037_v52 = vmul.f32 -1.442695, %v619_v43  ;;  %v1082_v53 = vmul.f32 1.442695, %v619_v43  ;;  %v621_v54 = vadd.f32 %v620_v49, %v2806_v34  ;;  %v731_v55 = vpop.f32.mrf.mxu1 }
 0x263   :  { %v2045_v57 = vmul.f32 -1.442695, %v740_v48  ;;  %v1098_v58 = vmul.f32 1.442695, %v740_v48  ;;  %v732_v59 = vadd.f32 %v731_v55, %v2798_v31  ;;  %v622_v60 = vpop.f32.mrf.mxu0 }
 0x264   :  { %2237 = vpow2.f32 %v2037_v52  ;;  %v2038_v63 = vmul.f32 -1.442695, %v621_v54  ;;  %v623_v0 = vadd.f32 %v622_v60, %v2789_v28  ;;  %v2177_v1 = vpop.f32.mrf.mxu1  ;;  %v1084_v3 = vmul.f32 1.442695, %v621_v54  ;;  %v2879_v52 = vpop.permute.xlu1 %1223 }
 0x265   :  { %2239 = vpow2.f32 %v1082_v53  ;;  %v624_v4 = vpop.f32.mrf.mxu0  ;;  %v2039_v8 = vmul.f32 -1.442695, %v732_v59  ;;  %v743_v9 = vadd.f32 %v2177_v1, %v2798_v31  ;;  %v1086_v11 = vmul.f32 1.442695, %v732_v59  ;;  %4445 = vst [vmem:[#allocation8_spill] sm:$0xff] %v2879_v52 }
 0x266   :  { %2241 = vpow2.f32 %v2045_v57  ;;  %v734_v10 = vpop.f32.mrf.mxu1  ;;  %v625_v12 = vadd.f32 %v624_v4, %v2806_v34  ;;  %v2040_v15 = vmul.f32 -1.442695, %v623_v0  ;;  %v1088_v19 = vmul.f32 1.442695, %v623_v0 }
 0x267   :  { %2243 = vpow2.f32 %v1098_v58  ;;  %v628_v13 = vpop.f32.mrf.mxu0  ;;  %v735_v16 = vadd.f32 %v734_v10, %v2798_v31  ;;  %v2048_v29 = vmul.f32 -1.442695, %v743_v9  ;;  %v1104_v44 = vmul.f32 1.442695, %v743_v9 }
 0x268   :  { %2245 = vpow2.f32 %v2038_v63  ;;  %v2180_v17 = vpop.f32.mrf.mxu1  ;;  %v629_v20 = vadd.f32 %v628_v13, %v2789_v28  ;;  %v2041_v48 = vmul.f32 -1.442695, %v625_v12  ;;  %v1090_v54 = vmul.f32 1.442695, %v625_v12  ;;  %v2891_v12 = vpop.permute.xlu0 %1406 }
 0x269   :  { %2247 = vpow2.f32 %v1084_v3  ;;  %v630_v21 = vpop.f32.mrf.mxu0  ;;  %v756_v30 = vadd.f32 %v2180_v17, %v2798_v31  ;;  %v2042_v55 = vmul.f32 -1.442695, %v735_v16  ;;  %v1092_v59 = vmul.f32 1.442695, %v735_v16  ;;  %4446 = vst [vmem:[#allocation9_spill] sm:$0xff] %v2891_v12 }
 0x26a   :  { %2249 = vpow2.f32 %v2039_v8  ;;  %v747_v37 = vpop.f32.mrf.mxu1  ;;  %v631_v49 = vadd.f32 %v630_v21, %v2806_v34  ;;  %v2043_v60 = vmul.f32 -1.442695, %v629_v20  ;;  %v1094_v1 = vmul.f32 1.442695, %v629_v20 }
 0x26b   :  { %2251 = vpow2.f32 %v1086_v11  ;;  %v632_v53 = vpop.f32.mrf.mxu0  ;;  %v748_v57 = vadd.f32 %v747_v37, %v2798_v31  ;;  %v2883_v3 = vmul.f32 -1.442695, %v756_v30  ;;  %v2886_v9 = vmul.f32 1.442695, %v756_v30  ;;  %v2902_v30 = vpop.permute.xlu1 %1233 }
 0x26c   :  { %2253 = vpow2.f32 %v2040_v15  ;;  %v2181_v58 = vpop.f32.mrf.mxu1  ;;  %v633_v63 = vadd.f32 %v632_v53, %v2789_v28  ;;  %v2888_v10 = vmul.f32 -1.442695, %v631_v49  ;;  %v2893_v15 = vmul.f32 1.442695, %v631_v49  ;;  %4447 = vst [vmem:[#allocation10_spill] sm:$0xff] %v2902_v30  ;;  %v2927_v18 = vpop.permute.xlu0 %1414 }
 0x26d   :  { %2255 = vpow2.f32 %v1088_v19  ;;  %v634_v0 = vpop.f32.mrf.mxu0  ;;  %v759_v4 = vadd.f32 %v2181_v58, %v2798_v31  ;;  %v2895_v16 = vmul.f32 -1.442695, %v748_v57  ;;  %v2898_v21 = vmul.f32 1.442695, %v748_v57  ;;  %4449 = vst [vmem:[#allocation12_spill] sm:$0xff] %v2927_v18 }
 0x26e   :  { %2257 = vpow2.f32 %v2048_v29  ;;  %v750_v8 = vpop.f32.mrf.mxu1  ;;  %v635_v11 = vadd.f32 %v634_v0, %v2806_v34  ;;  %v2900_v29 = vmul.f32 -1.442695, %v633_v63  ;;  %v2907_v49 = vmul.f32 1.442695, %v633_v63 }
 0x26f   :  { %2259 = vpow2.f32 %v1104_v44  ;;  %v638_v13 = vpop.f32.mrf.mxu0  ;;  %v751_v17 = vadd.f32 %v750_v8, %v2798_v31  ;;  %v2909_v58 = vmul.f32 -1.442695, %v759_v4 }
 0x270   :  { %2261 = vpow2.f32 %v2041_v48  ;;  %v2184_v19 = vpop.f32.mrf.mxu1  ;;  %v639_v37 = vadd.f32 %v638_v13, %v2789_v28  ;;  %v2913_v57 = vmul.f32 -1.442695, %v635_v11 }
 0x271   :  { %v2238_v20 = vpop.eup %2237  ;;  %2263 = vpow2.f32 %v1090_v54  ;;  %v640_v44 = vpop.f32.mrf.mxu0  ;;  %v2911_v54 = vmul.f32 1.442695, %v759_v4  ;;  %v772_v24 = vadd.f32 %v2184_v19, %v2798_v31  ;;  %v2922_v14 = vmul.f32 1.442695, %v751_v17 }
 0x272   :  { %v2905_v53 = vpop.eup %2239  ;;  %v938_v48 = vadd.f32 1.0, %v2238_v20  ;;  %2265 = vpow2.f32 %v2042_v55  ;;  %v763_v0 = vpop.f32.mrf.mxu1  ;;  %v2918_v20 = vmul.f32 1.442695, %v635_v11  ;;  %v2920_v55 = vmul.f32 -1.442695, %v751_v17 }
 0x273   :  { %v2242_v8 = vpop.eup %2241  ;;  %2267 = vpow2.f32 %v1092_v59  ;;  %v642_v51 = vpop.f32.mrf.mxu0  ;;  %v2924_v59 = vmul.f32 -1.442695, %v639_v37  ;;  %v641_v4 = vadd.f32 %v640_v44, %v2806_v34  ;;  %v2931_v11 = vmul.f32 1.442695, %v639_v37 }
 0x274   :  { %v2916_v13 = vpop.eup %2243  ;;  %2269 = vrcp.f32 %v938_v48  ;;  %v946_v43 = vadd.f32 1.0, %v2242_v8  ;;  %v2185_v63 = vpop.f32.mrf.mxu1  ;;  %v764_v8 = vadd.f32 %v763_v0, %v2798_v31  ;;  %v2938_v17 = vmul.f32 -1.442695, %v772_v24 }
 0x275   :  { %4448 = vst [vmem:[#allocation11_spill] sm:$0xff] %v2916_v13  ;;  %v2246_v50 = vpop.eup %2245  ;;  %2271 = vpow2.f32 %v2043_v60  ;;  %v644_v19 = vpop.f32.mrf.mxu0  ;;  %v2936_v60 = vmul.f32 %v2905_v53, %v2815_v38  ;;  %v643_v7 = vadd.f32 %v642_v51, %v2789_v28  ;;  %v2949_v37 = vmul.f32 1.442695, %v772_v24 }
 0x276   :  { %v2929_v25 = vpop.eup %2247  ;;  %2273 = vrcp.f32 %v946_v43  ;;  %v939_v48 = vadd.f32 1.0, %v2246_v50  ;;  %v2940_v44 = vpop.permute.xlu1 %1243  ;;  %v2947_v50 = vmul.f32 %v2916_v13, %v2818_v39  ;;  %v2954_v56 = vmul.f32 1.442695, %v641_v4 }
 0x277   :  { %v2250_v47 = vpop.eup %2249  ;;  %2275 = vpow2.f32 %v1094_v1  ;;  %4450 = vst [vmem:[#allocation13_spill] sm:$0xff] %v2940_v44  ;;  %v766_v62 = vpop.f32.mrf.mxu1  ;;  %v2952_v1 = vmul.f32 -1.442695, %v641_v4  ;;  %v775_v51 = vadd.f32 %v2185_v63, %v2798_v31  ;;  %v2959_v52 = vmul.f32 %v2929_v25, %v2821_v40 }
 0x278   :  { %v2943_v6 = vpop.eup %2251  ;;  %4451 = vst [vmem:[#allocation14_spill] sm:$0xff] %v2947_v50  ;;  %2277 = vrcp.f32 %v939_v48  ;;  %v940_v43 = vadd.f32 1.0, %v2250_v47  ;;  %v648_v44 = vpop.f32.mrf.mxu0  ;;  %v2961_v47 = vmul.f32 -1.442695, %v764_v8  ;;  %v2966_v61 = vmul.f32 -1.442695, %v643_v7 }
 0x279   :  { %v2254_v0 = vpop.eup %2253  ;;  %2279 = vpow2.f32 %v2883_v3  ;;  %v2964_v3 = vmul.f32 1.442695, %v764_v8  ;;  %v645_v4 = vadd.f32 %v644_v19, %v2806_v34  ;;  %v2969_v63 = vpop.permute.xlu0 %1422  ;;  %v2977_v50 = vmul.f32 1.442695, %v643_v7 }
 0x27a   :  { %v2256_v12 = vpop.eup %2255  ;;  %2281 = vrcp.f32 %v940_v43  ;;  %v941_v48 = vadd.f32 1.0, %v2254_v0  ;;  %4453 = vst [vmem:[#allocation16_spill] sm:$0xff] %v2966_v61  ;;  %4454 = vst [vmem:[#allocation17_spill] sm:$0xff] %v2969_v63  ;;  %v2188_v18 = vpop.f32.mrf.mxu1  ;;  %v2975_v43 = vmul.f32 %v2943_v6, %v2818_v39  ;;  %v2980_v8 = vmul.f32 -1.442695, %v775_v51 }
 0x27b   :  { %v2258_v24 = vpop.eup %2257  ;;  %2283 = vpow2.f32 %v2886_v9  ;;  %4452 = vst [vmem:[#allocation15_spill] sm:$0xff] %v2964_v3  ;;  %4456 = vst [vmem:[#allocation19_spill] sm:$0xff] %v2977_v50  ;;  %v2982_v30 = vmul.f32 1.442695, %v775_v51  ;;  %v2984_v19 = vpop.permute.xlu1 %1253  ;;  %v767_v63 = vadd.f32 %v766_v62, %v2798_v31  ;;  %v2988_v3 = vmul.f32 %v2256_v12, %v2826_v42 }
 0x27c   :  { %v2971_v13 = vpop.eup %2259  ;;  %2285 = vrcp.f32 %v941_v48  ;;  %v949_v0 = vadd.f32 1.0, %v2258_v24  ;;  %4457 = vst [vmem:[#allocation20_spill] sm:$0xff] %v2980_v8  ;;  %4459 = vst [vmem:[#allocation22_spill] sm:$0xff] %v2984_v19  ;;  %v650_v32 = vpop.f32.mrf.mxu0  ;;  %v649_v7 = vadd.f32 %v648_v44, %v2789_v28  ;;  %v2995_v51 = vmul.f32 -1.442695, %v645_v4 }
 0x27d   :  { %4455 = vst [vmem:[#allocation18_spill] sm:$0xff] %v2971_v13  ;;  %v2262_v9 = vpop.eup %2261  ;;  %2287 = vpow2.f32 %v2888_v10  ;;  %4458 = vst [vmem:[#allocation21_spill] sm:$0xff] %v2982_v30  ;;  %v2992_v10 = vmul.f32 %v2256_v12, %v2815_v38  ;;  %v2997_v19 = vmul.f32 1.442695, %v645_v4  ;;  %v779_v62 = vpop.f32.mrf.mxu1  ;;  %v3001_v8 = vmul.f32 %v2971_v13, %v2818_v39 }
 0x27e   :  { %v2264_v61 = vpop.eup %2263  ;;  %4460 = vst [vmem:[#allocation23_spill] sm:$0xff] %v2988_v3  ;;  %2289 = vrcp.f32 %v949_v0  ;;  %v942_v48 = vadd.f32 1.0, %v2262_v9  ;;  %4462 = vst [vmem:[#allocation25_spill] sm:$0xff] %v2995_v51  ;;  %v788_v44 = vadd.f32 %v2188_v18, %v2798_v31  ;;  %v3007_v12 = vmul.f32 -1.442695, %v767_v63  ;;  %v3012_v3 = vpop.permute.xlu0 %1430 }
 0x27f   :  { %v2266_v24 = vpop.eup %2265  ;;  %4461 = vst [vmem:[#allocation24_spill] sm:$0xff] %v2992_v10  ;;  %2291 = vpow2.f32 %v2893_v15  ;;  %4463 = vst [vmem:[#allocation26_spill] sm:$0xff] %v2997_v19  ;;  %v3009_v15 = vmul.f32 1.442695, %v767_v63  ;;  %v651_v4 = vadd.f32 %v650_v32, %v2806_v34  ;;  %v652_v19 = vpop.f32.mrf.mxu0  ;;  %v780_v18 = vadd.f32 %v779_v62, %v2798_v31 }
 0x280   :  { %v2268_v30 = vpop.eup %2267  ;;  %4464 = vst [vmem:[#allocation27_spill] sm:$0xff] %v3001_v8  ;;  %2293 = vrcp.f32 %v942_v48  ;;  %v943_v0 = vadd.f32 1.0, %v2266_v24  ;;  %4465 = vst [vmem:[#allocation28_spill] sm:$0xff] %v3007_v12  ;;  %v3014_v8 = vmul.f32 -1.442695, %v649_v7  ;;  %v3025_v63 = vmul.f32 %v2264_v61, %v2821_v40 }
 0x281   :  { %v3004_v9 = vpop.eup %2269  ;;  %2295 = vpow2.f32 %v2895_v16  ;;  %4466 = vst [vmem:[#allocation29_spill] sm:$0xff] %v3009_v15  ;;  %4467 = vst [vmem:[#allocation30_spill] sm:$0xff] %v3012_v3  ;;  %v3016_v48 = vmul.f32 1.442695, %v649_v7  ;;  %v3022_v16 = vmul.f32 %v2264_v61, %v2830_v45  ;;  %v3028_v3 = vpop.permute.xlu1 %1263  ;;  %v3033_v7 = vmul.f32 %v2268_v30, %v2833_v46 }
 0x282   :  { %v2272_v51 = vpop.eup %2271  ;;  %2297 = vrcp.f32 %v943_v0  ;;  %4468 = vst [vmem:[#allocation31_spill] sm:$0xff] %v3014_v8  ;;  %4472 = vst [vmem:[#allocation35_spill] sm:$0xff] %v3025_v63  ;;  %v3036_v62 = vmul.f32 %v2268_v30, %v2818_v39  ;;  %v3039_v13 = vmul.f32 -1.442695, %v788_v44  ;;  %v4478_v61 = vrot.slane %v2803_v33, %v2779_v23 }
 0x283   :  { %4469 = vst [vmem:[#allocation32_spill] sm:$0xff] %v3016_v48  ;;  %v3019_v24 = vpop.eup %2273  ;;  %4471 = vst [vmem:[#allocation34_spill] sm:$0xff] %v3022_v16  ;;  %v944_v32 = vadd.f32 1.0, %v2272_v51  ;;  %2299 = vpow2.f32 %v2898_v21  ;;  %v2189_v48 = vpop.f32.mrf.mxu1  ;;  %v3052_v30 = vmul.f32 1.442695, %v788_v44  ;;  %v653_v44 = vadd.f32 %v652_v19, %v2789_v28 }
 0x284   :  { %4470 = vst [vmem:[#allocation33_spill] sm:$0xff] %v3019_v24  ;;  %4473 = vst [vmem:[#allocation36_spill] sm:$0xff] %v3028_v3  ;;  %v3030_v0 = vpop.eup %2275  ;;  %2301 = vpow2.f32 %v2900_v29  ;;  %vm3044_vm8 = vcmp.eq.s32.totalorder %v4478_v61, 1  ;;  %v1284_v3 = vadd.f32 %v3019_v24, %v2823_v41  ;;  %v3054_v8 = vmul.f32 -1.442695, %v651_v4  ;;  %v654_v29 = vpop.f32.mrf.mxu0 }
 0x285   :  { %4474 = vst [vmem:[#allocation37_spill] sm:$0xff] %v3030_v0  ;;  %4475 = vst [vmem:[#allocation38_spill] sm:$0xff] %v3033_v7  ;;  %v3048_v51 = vpop.eup %2277  ;;  %2303 = vrcp.f32 %v944_v32  ;;  %v3064_v7 = vmul.f32 1.442695, %v651_v4  ;;  %v3066_v16 = vmul.f32 -1.442695, %v780_v18  ;;  %v4488_v32 = vrot.slane %v2809_v35, %v2779_v23 }
 0x286   :  { %4476 = vst [vmem:[#allocation39_spill] sm:$0xff] %v3036_v62  ;;  %4477 = vst [vmem:[#allocation40_spill] sm:$0xff] %v3039_v13  ;;  %v4483_v13 = vrot.slane %v2803_v33, %v2786_v27  ;;  %v2280_v61 = vpop.eup %2279  ;;  %2305 = vpow2.f32 %v2907_v49  ;;  %v4494_v19 = vrot.slane %v2803_v33, %v2784_v26  ;;  %v4498_v24 = vrot.slane %v2812_v36, %v2779_v23 }
 0x287   :  { %4481 = vst [vmem:[#allocation41_spill] sm:$0xff] %v3052_v30  ;;  %4482 = vst [vmem:[#allocation42_spill] sm:$0xff] %v3054_v8  ;;  %vm3072_vm10 = vcmp.eq.s32.totalorder %v4488_v32, 1  ;;  %v3083_v49 = vpop.eup %2281  ;;  %v958_v4 = vadd.f32 1.0, %v2280_v61  ;;  %2307 = vpow2.f32 %v2909_v58  ;;  %v3093_v32 = vmul.f32 1.442695, %v780_v18 }
 0x288   :  { %vm3059_vm9 = vcmp.eq.s32.totalorder %v4483_v13, 1  ;;  %4486 = vst [vmem:[#allocation43_spill] sm:$0xff] %v3064_v7  ;;  %4487 = vst [vmem:[#allocation44_spill] sm:$0xff] %v3066_v16  ;;  %v4491_v13 = vrot.slane %v2809_v35, %v2786_v27  ;;  %vm3088_vm12 = vcmp.eq.s32.totalorder %v4494_v19, 1  ;;  %v791_v7 = vadd.f32 %v2189_v48, %v2798_v31  ;;  %v3103_v61 = vpop.eup %2283 }
 0x289   :  { %4497 = vst [vmem:[#allocation45_spill] sm:$0xff] %v3093_v32  ;;  %vm3099_vm13 = vcmp.eq.s32.totalorder %v4498_v24, 1  ;;  %v3107_v33 = vmul.f32 %v3030_v0, %v2815_v38  ;;  %2309 = vpow2.f32 %v2911_v54  ;;  %v3111_v58 = vadd.f32 %v654_v29, %v2806_v34  ;;  %v3128_v54 = vpop.eup %2285 }
 0x28a   :  { %vm3079_vm11 = vcmp.eq.s32.totalorder %v4491_v13, 1  ;;  %v1199_v13 = vpop.permute.xlu0 %1198  ;;  %v4502_v18 = vrot.slane %v2812_v36, %v2786_v27  ;;  %v4505_v19 = vrot.slane %v2853_v2, %v2779_v23  ;;  %4508 = vst [vmem:[#allocation47_spill] sm:$0xff] %v3128_v54  ;;  %v3130_v29 = vmul.f32 52.0, %v1284_v3  ;;  %v1375_v3 = vpop.permute.xlu1 %1374 }
 0x28b   :  { %4501 = vst [vmem:[#allocation46_spill] sm:$0xff] %v3107_v33  ;;  %v1276_v48 = vadd.f32 %v3004_v9, %v1199_v13  ;;  %2311 = vrcp.f32 %v958_v4  ;;  %v4510_v33 = vrot.slane %v2809_v35, %v2784_v26  ;;  %v1277_v0 = vadd.f32 %v3048_v51, %v1199_v13  ;;  %v2288_v4 = vpop.eup %2287 }
 0x28c   :  { %vm3117_vm14 = vcmp.eq.s32.totalorder %v4502_v18, 1  ;;  %vm3124_vm15 = vcmp.eq.s32.totalorder %v4505_v19, 1  ;;  %4509 = vst [vmem:[#allocation48_spill] sm:$0xff] %v3130_v29  ;;  %v1278_v23 = vadd.f32 %v3083_v49, %v1199_v13  ;;  %v4513_v19 = vrot.slane %v2853_v2, %v2786_v27 }
 0x28d   :  { %vm3135_vm0 = vcmp.eq.s32.totalorder %v4510_v33, 1  ;;  %v4516_v35 = vrot.slane %v2812_v36, %v2784_v26  ;;  %2313 = vpow2.f32 %v2913_v57  ;;  %v3156_v29 = vmul.f32 -1.442695, %v653_v44 }
 0x28e   :  { %vm3144_vm1 = vcmp.eq.s32.totalorder %v4513_v19, 1  ;;  %v3158_v13 = vmul.f32 1.442695, %v653_v44  ;;  %v1437_v27 = vadd.f32 %v3004_v9, %v1375_v3  ;;  %v3161_v19 = vpop.eup %2289  ;;  %v945_v62 = vadd.f32 1.0, %v2288_v4 }
 0x28f   :  { %vm3151_vm2 = vcmp.eq.s32.totalorder %v4516_v35, 1  ;;  %4519 = vst [vmem:[#allocation49_spill] sm:$0xff] %v3156_v29  ;;  %4521 = vst [vmem:[#allocation51_spill] sm:$0xff] %v3161_v19  ;;  %2315 = vpow2.f32 %v2918_v20  ;;  %v3164_v63 = vmul.f32 -1.442695, %v791_v7  ;;  %v4523_v36 = vrot.slane %v2853_v2, %v2784_v26  ;;  %v3174_v44 = vpop.eup %2291 }
 0x290   :  { %4520 = vst [vmem:[#allocation50_spill] sm:$0xff] %v3158_v13  ;;  %v1438_v57 = vadd.f32 %v3048_v51, %v1375_v3  ;;  %2317 = vpow2.f32 %v2920_v55  ;;  %v3177_v13 = vmul.f32 1.442695, %v791_v7  ;;  %v1324_v4 = vmul.f32 52.0, %v1276_v48  ;;  %v3180_v29 = vpop.eup %2293 }
 0x291   :  { %4522 = vst [vmem:[#allocation52_spill] sm:$0xff] %v3164_v63  ;;  %vm3169_vm3 = vcmp.eq.s32.totalorder %v4523_v36, 1  ;;  %v1439_v20 = vadd.f32 %v3083_v49, %v1375_v3  ;;  %2319 = vrcp.f32 %v945_v62  ;;  %v1325_v63 = vmul.f32 52.0, %v1277_v0  ;;  %v2296_v36 = vpop.eup %2295 }
 0x292   :  { %v1326_v26 = vmul.f32 52.0, %v1278_v23  ;;  %v1485_v2 = vmul.f32 52.0, %v1437_v27  ;;  %2321 = vpow2.f32 %v2922_v14  ;;  %v1486_v10 = vmul.f32 52.0, %v1438_v57  ;;  %v3185_v55 = vpop.eup %2297 }
 0x293   :  { %v1487_v50 = vmul.f32 52.0, %v1439_v20  ;;  %v1551_v54 = vmul.f32 %v2905_v53, %v2826_v42  ;;  %v952_v7 = vadd.f32 1.0, %v2296_v36  ;;  %2323 = vpow2.f32 %v2924_v59  ;;  %v2300_v62 = vpop.eup %2299 }
 0x294   :  { %v1552_v48 = vmul.f32 %v2929_v25, %v2830_v45  ;;  %v1681_v0 = vsel %vm3044_vm8, %v2936_v60, %v3004_v9  ;;  %2325 = vpow2.f32 %v2931_v11  ;;  %v1553_v14 = vmul.f32 %v2943_v6, %v2833_v46  ;;  %v2302_v59 = vpop.eup %2301 }
 0x295   :  { %v1682_v53 = vsel %vm3059_vm9, %v2959_v52, %v3048_v51  ;;  %v1683_v25 = vsel %vm3088_vm12, %v2975_v43, %v3083_v49  ;;  %v1287_v60 = vadd.f32 %v3161_v19, %v2855_v5  ;;  %2327 = vrcp.f32 %v952_v7  ;;  %v3211_v9 = vpop.eup %2303 }
 0x296   :  { %v1745_v11 = vsel %vm3072_vm10, %v1551_v54, %v1681_v0  ;;  %v1746_v6 = vsel %vm3079_vm11, %v1552_v48, %v1682_v53  ;;  %v947_v23 = vadd.f32 1.0, %v2302_v59  ;;  %2329 = vpow2.f32 %v2938_v17  ;;  %v3218_v51 = vpop.eup %2305  ;;  %v658_v17 = vpop.f32.mrf.mxu0 }
 0x297   :  { %v1747_v52 = vsel %vm3135_vm0, %v1553_v14, %v1683_v25  ;;  %v1809_v43 = vsel %vm3099_vm13, %v1485_v2, %v1745_v11  ;;  %4526 = vst [vmem:[#allocation53_spill] sm:$0xff] %v3218_v51  ;;  %2331 = vpow2.f32 %v2949_v37  ;;  %v1810_v49 = vsel %vm3117_vm14, %v1486_v10, %v1746_v6  ;;  %v2308_v27 = vpop.eup %2307 }
 0x298   :  { %v1811_v54 = vsel %vm3151_vm2, %v1487_v50, %v1747_v52  ;;  %v1873_v3 = vsel %vm3124_vm15, %v1324_v4, %v1809_v43  ;;  %2333 = vrcp.f32 %v947_v23  ;;  %v3228_v57 = vmul.f32 -1.442695, %v3111_v58  ;;  %v782_v50 = vpop.f32.mrf.mxu1  ;;  %v3237_v10 = vpop.eup %2309  ;;  %v4534_v23 = vld [vmem:[#allocation15_spill] sm:$0xff] }
 0x299   :  { %v1874_v20 = vsel %vm3144_vm1, %v1325_v63, %v1810_v49  ;;  %v1875_v37 = vsel %vm3169_vm3, %v1326_v26, %v1811_v54  ;;  %1921 = vst [vmem:[%s4387_s11] sm:$0xff] %v1873_v3  ;;  %4527 = vst [vmem:[#allocation54_spill] sm:$0xff] %v3237_v10  ;;  %v1637_v4 = vmul.f32 %v3103_v61, %v2818_v39  ;;  %v961_v2 = vadd.f32 1.0, %v2308_v27  ;;  %v3251_v63 = vpop.eup %2311  ;;  %v660_v53 = vpop.f32.mrf.mxu0 }
 0x29a   :  { %2335 = vpow2.f32 %v2952_v1  ;;  %v3243_v36 = vmul.f32 1.442695, %v3111_v58  ;;  %1922 = vst [vmem:[%s4387_s11 + $0x8] sm:$0xff] %v1874_v20  ;;  %1923 = vst [vmem:[%s4387_s11 + $0x10] sm:$0xff] %v1875_v37  ;;  %v3253_v26 = vmul.f32 52.0, %v1287_v60  ;;  %v3257_v7 = vmul.f32 %v3174_v44, %v2821_v40  ;;  %v2314_v58 = vpop.eup %2313  ;;  %v4539_v20 = vld [vmem:[#allocation47_spill] sm:$0xff] }
 0x29b   :  { %4528 = vst [vmem:[#allocation55_spill] sm:$0xff] %v3251_v63  ;;  %v1571_v1 = vmul.f32 %v3103_v61, %v2833_v46  ;;  %2337 = vpow2.f32 %v2954_v56  ;;  %v1457_v48 = vadd.f32 %v3251_v63, %v2871_v22  ;;  %v3265_v0 = vmul.f32 %v2300_v62, %v2833_v46 }
 0x29c   :  { %4529 = vst [vmem:[#allocation56_spill] sm:$0xff] %v3253_v26  ;;  %2339 = vrcp.f32 %v961_v2  ;;  %v783_v14 = vadd.f32 %v782_v50, %v2798_v31  ;;  %v3268_v25 = vpop.eup %2315  ;;  %v1701_v59 = vsel %vm3088_vm12, %v1637_v4, %v3251_v63  ;;  %v948_v61 = vadd.f32 1.0, %v2314_v58  ;;  %v4545_v26 = vld [vmem:[#allocation21_spill] sm:$0xff] }
 0x29d   :  { %4530 = vst [vmem:[#allocation57_spill] sm:$0xff] %v3265_v0  ;;  %4531 = vst [vmem:[#allocation58_spill] sm:$0xff] %v3268_v25  ;;  %2341 = vpow2.f32 %v2961_v47  ;;  %v659_v56 = vadd.f32 %v658_v17, %v2789_v28  ;;  %v2318_v60 = vpop.eup %2317  ;;  %v3276_v11 = vmul.f32 %v2300_v62, %v2818_v39  ;;  %v3280_v6 = vmul.f32 %v3218_v51, %v2815_v38  ;;  %v1204_v62 = vpop.permute.xlu0 %1203  ;;  %v4538_v17 = vld [vmem:[#allocation16_spill] sm:$0xff] }
 0x29e   :  { %v3284_v31 = vmul.f32 %v3237_v10, %v2818_v39  ;;  %2343 = vpow2.f32 %v4534_v23  ;;  %v3287_v52 = vpop.eup %2319  ;;  %v3289_v43 = vmul.f32 52.0, %v1457_v48  ;;  %v955_v47 = vadd.f32 1.0, %v2318_v60 }
 0x29f   :  { %4532 = vst [vmem:[#allocation59_spill] sm:$0xff] %v3280_v6  ;;  %2345 = vrcp.f32 %v948_v61  ;;  %v661_v49 = vadd.f32 %v660_v53, %v2806_v34  ;;  %v3292_v54 = vpop.eup %2321  ;;  %v3296_v3 = vsel %vm3135_vm0, %v1571_v1, %v1701_v59  ;;  %v3299_v27 = vmul.f32 -1.442695, %v783_v14  ;;  %v4541_v1 = vld [vmem:[#allocation19_spill] sm:$0xff]  ;;  %v4542_v61 = vld [vmem:[#allocation2_spill] sm:$0xff] }
 0x2a0   :  { %4533 = vst [vmem:[#allocation60_spill] sm:$0xff] %v3284_v31  ;;  %4535 = vst [vmem:[#allocation15_spill] sm:$0xff] %v3289_v43  ;;  %2347 = vpow2.f32 %v4538_v17  ;;  %v1279_v37 = vadd.f32 %v4539_v20, %v1204_v62  ;;  %v2324_v50 = vpop.eup %2323  ;;  %v3304_v4 = vmul.f32 %v3268_v25, %v2821_v40  ;;  %v3306_v2 = vmul.f32 1.442695, %v783_v14  ;;  %v4543_v14 = vld [vmem:[#allocation20_spill] sm:$0xff]  ;;  %v4549_v6 = vld [vmem:[#allocation35_spill] sm:$0xff] }
 0x2a1   :  { %4536 = vst [vmem:[#allocation61_spill] sm:$0xff] %v3292_v54  ;;  %4537 = vst [vmem:[#allocation62_spill] sm:$0xff] %v3296_v3  ;;  %2349 = vrcp.f32 %v955_v47  ;;  %v3308_v58 = vmul.f32 -1.442695, %v659_v56  ;;  %v2326_v48 = vpop.eup %2325  ;;  %v950_v53 = vadd.f32 1.0, %v2324_v50  ;;  %v1440_v60 = vadd.f32 %v4539_v20, %v4542_v61  ;;  %v4550_v25 = vld [vmem:[#allocation39_spill] sm:$0xff] }
 0x2a2   :  { %4540 = vst [vmem:[#allocation16_spill] sm:$0xff] %v3304_v4  ;;  %2351 = vpow2.f32 %v4541_v1  ;;  %v3311_v59 = vmul.f32 1.442695, %v659_v56  ;;  %v3315_v23 = vpop.eup %2327  ;;  %v3322_v17 = vmul.f32 -1.442695, %v661_v49  ;;  %v1280_v50 = vadd.f32 %v3180_v29, %v1204_v62 }
 0x2a3   :  { %2353 = vpow2.f32 %v4543_v14  ;;  %v2330_v31 = vpop.eup %2329  ;;  %v1281_v56 = vadd.f32 %v3185_v55, %v1204_v62  ;;  %v1441_v1 = vadd.f32 %v3180_v29, %v4542_v61  ;;  %v1442_v10 = vadd.f32 %v3185_v55, %v4542_v61  ;;  %v4546_v14 = vld [vmem:[#allocation24_spill] sm:$0xff] }
 0x2a4   :  { %4544 = vst [vmem:[#allocation47_spill] sm:$0xff] %v3322_v17  ;;  %2355 = vrcp.f32 %v950_v53  ;;  %v2332_v22 = vpop.eup %2331  ;;  %v970_v63 = vadd.f32 1.0, %v2330_v31  ;;  %v1488_v47 = vmul.f32 52.0, %v1440_v60  ;;  %v1684_v3 = vsel %vm3044_vm8, %v4546_v14, %v4539_v20  ;;  %v4548_v53 = vld [vmem:[#allocation25_spill] sm:$0xff] }
 0x2a5   :  { %2357 = vpow2.f32 %v4545_v26  ;;  %v3335_v43 = vpop.eup %2333  ;;  %v1327_v62 = vmul.f32 52.0, %v1279_v37  ;;  %v1489_v4 = vmul.f32 52.0, %v1441_v1  ;;  %v1685_v61 = vsel %vm3059_vm9, %v4549_v6, %v3180_v29  ;;  %v4552_v1 = vld [vmem:[#allocation23_spill] sm:$0xff]  ;;  %v4571_v17 = vld [vmem:[#allocation37_spill] sm:$0xff] }
 0x2a6   :  { %4547 = vst [vmem:[#allocation19_spill] sm:$0xff] %v3335_v43  ;;  %2359 = vpow2.f32 %v4548_v53  ;;  %v1328_v26 = vmul.f32 52.0, %v1280_v50  ;;  %v1490_v60 = vmul.f32 52.0, %v1442_v10  ;;  %v1686_v20 = vsel %vm3088_vm12, %v4550_v25, %v3185_v55  ;;  %v4551_v53 = vld [vmem:[#allocation26_spill] sm:$0xff] }
 0x2a7   :  { %v2336_v31 = vpop.eup %2335  ;;  %2361 = vrcp.f32 %v970_v63  ;;  %v1329_v37 = vmul.f32 52.0, %v1281_v56  ;;  %v1748_v19 = vsel %vm3072_vm10, %v4552_v1, %v1684_v3  ;;  %v4554_v63 = vld [vmem:[#allocation28_spill] sm:$0xff]  ;;  %v4555_v10 = vld [vmem:[#allocation34_spill] sm:$0xff]  ;;  %v1557_v0 = vmul.f32 %v4571_v17, %v2826_v42 }
 0x2a8   :  { %v3346_v14 = vpop.eup %2337  ;;  %v951_v51 = vadd.f32 1.0, %v2336_v31  ;;  %2363 = vpow2.f32 %v4551_v53  ;;  %v1749_v6 = vsel %vm3079_vm11, %v4555_v10, %v1685_v61  ;;  %v4556_v50 = vld [vmem:[#allocation38_spill] sm:$0xff]  ;;  %v1812_v25 = vsel %vm3099_vm13, %v1488_v47, %v1748_v19  ;;  %v1383_v10 = vpop.permute.xlu1 %1382 }
 0x2a9   :  { %v3352_v29 = vpop.eup %2339  ;;  %2365 = vpow2.f32 %v4554_v63  ;;  %v1750_v55 = vsel %vm3135_vm0, %v4556_v50, %v1686_v20  ;;  %v3363_v31 = vmul.f32 1.442695, %v661_v49  ;;  %v1813_v3 = vsel %vm3117_vm14, %v1489_v4, %v1749_v6  ;;  %v4558_v63 = vld [vmem:[#allocation29_spill] sm:$0xff]  ;;  %v4562_v6 = vld [vmem:[#allocation4_spill] sm:$0xff] }
 0x2aa   :  { %4553 = vst [vmem:[#allocation2_spill] sm:$0xff] %v3352_v29  ;;  %v2342_v56 = vpop.eup %2341  ;;  %2367 = vrcp.f32 %v951_v51  ;;  %v1814_v53 = vsel %vm3151_vm2, %v1490_v60, %v1750_v55  ;;  %v1876_v20 = vsel %vm3124_vm15, %v1327_v62, %v1812_v25  ;;  %v1877_v19 = vsel %vm3144_vm1, %v1328_v26, %v1813_v3  ;;  %v4561_v60 = vld [vmem:[#allocation31_spill] sm:$0xff] }
 0x2ab   :  { %4557 = vst [vmem:[#allocation20_spill] sm:$0xff] %v3363_v31  ;;  %v3369_v1 = vpop.eup %2343  ;;  %v964_v61 = vadd.f32 1.0, %v2342_v56  ;;  %2369 = vpow2.f32 %v4558_v63  ;;  %v3380_v49 = vmul.f32 %v3292_v54, %v2818_v39  ;;  %v3383_v4 = vmul.f32 %v2326_v48, %v2826_v42  ;;  %1924 = vst [vmem:[%s4387_s11 + $0x18] sm:$0xff] %v1876_v20  ;;  %v4564_v56 = vld [vmem:[#allocation32_spill] sm:$0xff] }
 0x2ac   :  { %v3376_v51 = vpop.eup %2345  ;;  %v3386_v47 = vmul.f32 %v2326_v48, %v2815_v38  ;;  %2371 = vpow2.f32 %v4561_v60  ;;  %1925 = vst [vmem:[%s4387_s11 + $0x20] sm:$0xff] %v1877_v19  ;;  %v1878_v26 = vsel %vm3169_vm3, %v1329_v37, %v1814_v53  ;;  %v1282_v48 = vadd.f32 %v3211_v9, %v4562_v6  ;;  %v4565_v19 = vld [vmem:[#allocation40_spill] sm:$0xff] }
 0x2ad   :  { %4559 = vst [vmem:[#allocation21_spill] sm:$0xff] %v3376_v51  ;;  %4560 = vst [vmem:[#allocation24_spill] sm:$0xff] %v3380_v49  ;;  %v2348_v62 = vpop.eup %2347  ;;  %2373 = vrcp.f32 %v964_v61  ;;  %v1283_v50 = vadd.f32 %v3287_v52, %v4562_v6  ;;  %v1443_v3 = vadd.f32 %v3211_v9, %v1383_v10  ;;  %v1444_v37 = vadd.f32 %v3287_v52, %v1383_v10  ;;  %v4568_v51 = vld [vmem:[#allocation41_spill] sm:$0xff] }
 0x2ae   :  { %v3401_v55 = vpop.eup %2349  ;;  %v953_v25 = vadd.f32 1.0, %v2348_v62  ;;  %2375 = vpow2.f32 %v4564_v56  ;;  %1926 = vst [vmem:[%s4387_s11 + $0x28] sm:$0xff] %v1878_v26  ;;  %v3412_v61 = vmul.f32 %v2332_v22, %v2818_v39  ;;  %v3416_v63 = vmul.f32 %v3346_v14, %v2830_v45  ;;  %v4566_v62 = vld [vmem:[#allocation10_spill] sm:$0xff]  ;;  %v4567_v56 = vld [vmem:[#allocation33_spill] sm:$0xff] }
 0x2af   :  { %4563 = vst [vmem:[#allocation25_spill] sm:$0xff] %v3401_v55  ;;  %v3409_v53 = vpop.eup %2351  ;;  %v3419_v20 = vmul.f32 %v2332_v22, %v2833_v46  ;;  %2377 = vpow2.f32 %v4565_v19  ;;  %v1299_v26 = vadd.f32 %v3352_v29, %v4566_v62  ;;  %v1330_v6 = vmul.f32 52.0, %v1282_v48  ;;  %v4570_v22 = vld [vmem:[#allocation42_spill] sm:$0xff]  ;;  %v4577_v29 = vld [vmem:[#allocation12_spill] sm:$0xff] }
 0x2b0   :  { %v2354_v60 = vpop.eup %2353  ;;  %2379 = vrcp.f32 %v953_v25  ;;  %v1445_v49 = vadd.f32 %v4567_v56, %v1383_v10  ;;  %v1331_v43 = vmul.f32 52.0, %v1283_v50  ;;  %v1491_v5 = vmul.f32 52.0, %v1443_v3  ;;  %v4572_v25 = vld [vmem:[#allocation46_spill] sm:$0xff] }
 0x2b1   :  { %v3425_v54 = vpop.eup %2355  ;;  %v973_v55 = vadd.f32 1.0, %v2354_v60  ;;  %2381 = vpow2.f32 %v4568_v51  ;;  %v1492_v19 = vmul.f32 52.0, %v1444_v37  ;;  %v1687_v10 = vsel %vm3044_vm8, %v4572_v25, %v3211_v9  ;;  %v4573_v3 = vld [vmem:[#allocation14_spill] sm:$0xff] }
 0x2b2   :  { %v3428_v31 = vpop.eup %2357  ;;  %2383 = vpow2.f32 %v4570_v22  ;;  %v1558_v51 = vmul.f32 %v3174_v44, %v2830_v45  ;;  %v1688_v50 = vsel %vm3059_vm9, %v3257_v7, %v3287_v52  ;;  %v1689_v17 = vsel %vm3088_vm12, %v4573_v3, %v4567_v56  ;;  %v4575_v22 = vld [vmem:[#allocation43_spill] sm:$0xff]  ;;  %v4578_v7 = vld [vmem:[#allocation44_spill] sm:$0xff] }
 0x2b3   :  { %4569 = vst [vmem:[#allocation35_spill] sm:$0xff] %v3428_v31  ;;  %v2360_v48 = vpop.eup %2359  ;;  %2385 = vrcp.f32 %v973_v55  ;;  %v1493_v9 = vmul.f32 52.0, %v1445_v49  ;;  %v4576_v55 = vld [vmem:[#allocation11_spill] sm:$0xff]  ;;  %v1751_v52 = vsel %vm3072_vm10, %v1557_v0, %v1687_v10 }
 0x2b4   :  { %v3447_v37 = vpop.eup %2361  ;;  %v954_v60 = vadd.f32 1.0, %v2360_v48  ;;  %2387 = vpow2.f32 %v4575_v22  ;;  %v1559_v25 = vmul.f32 %v4576_v55, %v2833_v46  ;;  %v1752_v56 = vsel %vm3079_vm11, %v1558_v51, %v1688_v50  ;;  %v662_v55 = vpop.f32.mrf.mxu0  ;;  %v4580_v51 = vld [vmem:[#allocation45_spill] sm:$0xff] }
 0x2b5   :  { %4574 = vst [vmem:[#allocation39_spill] sm:$0xff] %v3447_v37  ;;  %v3452_v44 = vpop.eup %2363  ;;  %v1469_v62 = vadd.f32 %v3447_v37, %v4577_v29  ;;  %2389 = vpow2.f32 %v4578_v7  ;;  %v1713_v49 = vsel %vm3088_vm12, %v3412_v61, %v3447_v37  ;;  %v1815_v22 = vsel %vm3099_vm13, %v1491_v5, %v1751_v52  ;;  %v4582_v61 = vld [vmem:[#allocation49_spill] sm:$0xff] }
 0x2b6   :  { %v2366_v48 = vpop.eup %2365  ;;  %2391 = vrcp.f32 %v954_v60  ;;  %v1753_v3 = vsel %vm3135_vm0, %v1559_v25, %v1689_v17  ;;  %v1816_v50 = vsel %vm3117_vm14, %v1492_v19, %v1752_v56  ;;  %v1879_v5 = vsel %vm3124_vm15, %v1330_v6, %v1815_v22  ;;  %v4583_v19 = vld [vmem:[#allocation48_spill] sm:$0xff] }
 0x2b7   :  { %v3469_v7 = vpop.eup %2367  ;;  %v3471_v0 = vmul.f32 52.0, %v1469_v62  ;;  %v967_v10 = vadd.f32 1.0, %v2366_v48  ;;  %2393 = vpow2.f32 %v4580_v51  ;;  %v1817_v17 = vsel %vm3151_vm2, %v1493_v9, %v1753_v3  ;;  %1927 = vst [vmem:[%s4387_s11 + $0x30] sm:$0xff] %v1879_v5  ;;  %v4586_v9 = vld [vmem:[#allocation50_spill] sm:$0xff]  ;;  %v664_v48 = vpop.f32.mrf.mxu0 }
 0x2b8   :  { %v3476_v29 = vpop.eup %2369  ;;  %2395 = vpow2.f32 %v4582_v61  ;;  %v1880_v62 = vsel %vm3144_vm1, %v1331_v43, %v1816_v50  ;;  %v3485_v25 = vmul.f32 52.0, %v1299_v26  ;;  %v3489_v52 = vmul.f32 %v3346_v14, %v2821_v40 }
 0x2b9   :  { %4579 = vst [vmem:[#allocation26_spill] sm:$0xff] %v3471_v0  ;;  %4581 = vst [vmem:[#allocation23_spill] sm:$0xff] %v3476_v29  ;;  %v2372_v60 = vpop.eup %2371  ;;  %2397 = vrcp.f32 %v967_v10  ;;  %v1881_v56 = vsel %vm3169_vm3, %v4583_v19, %v1817_v17  ;;  %v3504_v26 = vmul.f32 %v3369_v1, %v2833_v46  ;;  %v3508_v14 = vmul.f32 %v3369_v1, %v2818_v39  ;;  %v4588_v1 = vld [vmem:[#allocation52_spill] sm:$0xff] }
 0x2ba   :  { %1928 = vst [vmem:[%s4387_s11 + $0x38] sm:$0xff] %v1880_v62  ;;  %v3500_v43 = vpop.eup %2373  ;;  %v956_v6 = vadd.f32 1.0, %v2372_v60  ;;  %2399 = vpow2.f32 %v4586_v9  ;;  %1929 = vst [vmem:[%s4387_s11 + $0x40] sm:$0xff] %v1881_v56  ;;  %v3517_v22 = vsel %vm3135_vm0, %v3419_v20, %v1713_v49  ;;  %v3521_v10 = vmul.f32 %v3409_v53, %v2815_v38  ;;  %v1219_v60 = vpop.permute.xlu0 %1218 }
 0x2bb   :  { %4584 = vst [vmem:[#allocation28_spill] sm:$0xff] %v3504_v26  ;;  %4585 = vst [vmem:[#allocation34_spill] sm:$0xff] %v3508_v14  ;;  %v2376_v3 = vpop.eup %2375  ;;  %2401 = vpow2.f32 %v4588_v1  ;;  %v663_v51 = vadd.f32 %v662_v55, %v2789_v28  ;;  %v3531_v17 = vmul.f32 %v3428_v31, %v2818_v39  ;;  %v3535_v20 = vmul.f32 %v3452_v44, %v2821_v40 }
 0x2bc   :  { %4587 = vst [vmem:[#allocation38_spill] sm:$0xff] %v3517_v22  ;;  %v2378_v50 = vpop.eup %2377  ;;  %2403 = vrcp.f32 %v956_v6  ;;  %v3541_v55 = vmul.f32 %v3476_v29, %v2818_v39  ;;  %v665_v62 = vadd.f32 %v664_v48, %v2806_v34  ;;  %v1288_v56 = vadd.f32 %v3425_v54, %v1219_v60 }
 0x2bd   :  { %4589 = vst [vmem:[#allocation29_spill] sm:$0xff] %v3531_v17  ;;  %v3537_v49 = vpop.eup %2379  ;;  %v982_v5 = vadd.f32 1.0, %v2378_v50  ;;  %2405 = vpow2.f32 %v3177_v13  ;;  %v1289_v6 = vadd.f32 %v3469_v7, %v1219_v60  ;;  %v1290_v9 = vadd.f32 %v3315_v23, %v1219_v60 }
 0x2be   :  { %4590 = vst [vmem:[#allocation31_spill] sm:$0xff] %v3541_v55  ;;  %v3545_v19 = vpop.eup %2381  ;;  %2407 = vpow2.f32 %v3228_v57  ;;  %v3552_v61 = vmul.f32 %v2376_v3, %v2826_v42  ;;  %v3555_v50 = vmul.f32 %v2376_v3, %v2815_v38  ;;  %v2064_v13 = vmul.f32 -1.442695, %v663_v51  ;;  %v4592_v57 = vld [vmem:[#allocation5_spill] sm:$0xff] }
 0x2bf   :  { %v2384_v1 = vpop.eup %2383  ;;  %2409 = vrcp.f32 %v982_v5  ;;  %v1449_v31 = vadd.f32 %v3425_v54, %v4592_v57  ;;  %v1450_v60 = vadd.f32 %v3469_v7, %v4592_v57  ;;  %v1136_v0 = vmul.f32 1.442695, %v663_v51 }
 0x2c0   :  { %v3557_v48 = vpop.eup %2385  ;;  %v957_v17 = vadd.f32 1.0, %v2384_v1  ;;  %2411 = vpow2.f32 %v3243_v36  ;;  %v2065_v37 = vmul.f32 -1.442695, %v665_v62  ;;  %v1451_v3 = vadd.f32 %v3315_v23, %v4592_v57 }
 0x2c1   :  { %4591 = vst [vmem:[#allocation4_spill] sm:$0xff] %v3557_v48  ;;  %v2388_v22 = vpop.eup %2387  ;;  %2413 = vpow2.f32 %v3299_v27  ;;  %v1336_v55 = vmul.f32 52.0, %v1288_v56  ;;  %v1337_v1 = vmul.f32 52.0, %v1289_v6  ;;  %v1693_v36 = vsel %vm3044_vm8, %v3386_v47, %v3425_v54 }
 0x2c2   :  { %v2390_v5 = vpop.eup %2389  ;;  %2415 = vrcp.f32 %v957_v17  ;;  %v1497_v27 = vmul.f32 52.0, %v1449_v31  ;;  %v1498_v51 = vmul.f32 52.0, %v1450_v60  ;;  %v1499_v57 = vmul.f32 52.0, %v1451_v3  ;;  %v4595_v60 = vld [vmem:[#allocation22_spill] sm:$0xff] }
 0x2c3   :  { %v3571_v29 = vpop.eup %2391  ;;  %v976_v26 = vadd.f32 1.0, %v2390_v5  ;;  %2417 = vpow2.f32 %v3306_v2  ;;  %v1694_v17 = vsel %vm3059_vm9, %v3489_v52, %v3469_v7  ;;  %v1695_v54 = vsel %vm3088_vm12, %v3276_v11, %v3315_v23  ;;  %v4593_v52 = vld [vmem:[#allocation57_spill] sm:$0xff] }
 0x2c4   :  { %v3574_v14 = vpop.eup %2393  ;;  %2419 = vpow2.f32 %v3308_v58  ;;  %v1138_v2 = vmul.f32 1.442695, %v665_v62  ;;  %v1338_v31 = vmul.f32 52.0, %v1290_v9  ;;  %v1757_v56 = vsel %vm3072_vm10, %v3383_v4, %v1693_v36  ;;  %v1387_v36 = vpop.permute.xlu1 %1386 }
 0x2c5   :  { %v2396_v47 = vpop.eup %2395  ;;  %2421 = vrcp.f32 %v976_v26  ;;  %v1758_v7 = vsel %vm3079_vm11, %v3416_v63, %v1694_v17  ;;  %v1759_v11 = vsel %vm3135_vm0, %v4593_v52, %v1695_v54  ;;  %v4594_v26 = vld [vmem:[#allocation47_spill] sm:$0xff]  ;;  %v1821_v4 = vsel %vm3099_vm13, %v1497_v27, %v1757_v56  ;;  %v4596_v54 = vld [vmem:[#allocation20_spill] sm:$0xff] }
 0x2c6   :  { %v3588_v58 = vpop.eup %2397  ;;  %v959_v6 = vadd.f32 1.0, %v2396_v47  ;;  %2423 = vpow2.f32 %v3311_v59  ;;  %v1822_v62 = vsel %vm3117_vm14, %v1498_v51, %v1758_v7  ;;  %v1823_v59 = vsel %vm3151_vm2, %v1499_v57, %v1759_v11  ;;  %v4598_v57 = vld [vmem:[#allocation19_spill] sm:$0xff] }
 0x2c7   :  { %v3597_v23 = vpop.eup %2399  ;;  %2425 = vpow2.f32 %v4594_v26  ;;  %v1311_v63 = vadd.f32 %v3557_v48, %v4595_v60  ;;  %v1885_v3 = vsel %vm3124_vm15, %v1336_v55, %v1821_v4  ;;  %v1886_v5 = vsel %vm3144_vm1, %v1337_v1, %v1822_v62  ;;  %v4597_v55 = vld [vmem:[#allocation6_spill] sm:$0xff] }
 0x2c8   :  { %v2402_v9 = vpop.eup %2401  ;;  %2427 = vrcp.f32 %v959_v6  ;;  %v1887_v51 = vsel %vm3169_vm3, %v1338_v31, %v1823_v59  ;;  %1933 = vst [vmem:[%s4387_s11 + $0x60] sm:$0xff] %v1885_v3  ;;  %1934 = vst [vmem:[%s4387_s11 + $0x68] sm:$0xff] %v1886_v5  ;;  %v1285_v1 = vadd.f32 %v4598_v57, %v4597_v55  ;;  %v4600_v31 = vld [vmem:[#allocation21_spill] sm:$0xff]  ;;  %v1446_v6 = vadd.f32 %v4598_v57, %v1387_v36 }
 0x2c9   :  { %v3612_v17 = vpop.eup %2403  ;;  %v985_v27 = vadd.f32 1.0, %v2402_v9  ;;  %2429 = vpow2.f32 %v4596_v54  ;;  %1935 = vst [vmem:[%s4387_s11 + $0x70] sm:$0xff] %v1887_v51  ;;  %v1286_v56 = vadd.f32 %v4600_v31, %v4597_v55  ;;  %v1447_v7 = vadd.f32 %v4600_v31, %v1387_v36 }
 0x2ca   :  { %v3625_v47 = vpop.eup %2405  ;;  %2431 = vpow2.f32 %v2064_v13  ;;  %v3636_v11 = vmul.f32 %v3545_v19, %v2818_v39  ;;  %v3640_v26 = vmul.f32 %v3545_v19, %v2833_v46  ;;  %v4603_v13 = vld [vmem:[#allocation51_spill] sm:$0xff]  ;;  %v3646_v59 = vmul.f32 %v2388_v22, %v2830_v45 }
 0x2cb   :  { %4599 = vst [vmem:[#allocation32_spill] sm:$0xff] %v3625_v47  ;;  %v2408_v52 = vpop.eup %2407  ;;  %2433 = vrcp.f32 %v985_v27  ;;  %v1448_v4 = vadd.f32 %v4603_v13, %v1387_v36  ;;  %v3649_v9 = vmul.f32 %v2388_v22, %v2821_v40  ;;  %v3653_v54 = vmul.f32 52.0, %v1311_v63  ;;  %v4605_v27 = vld [vmem:[#allocation53_spill] sm:$0xff]  ;;  %v668_v63 = vpop.f32.mrf.mxu0 }
 0x2cc   :  { %4601 = vst [vmem:[#allocation40_spill] sm:$0xff] %v3636_v11  ;;  %4602 = vst [vmem:[#allocation33_spill] sm:$0xff] %v3640_v26  ;;  %v3643_v62 = vpop.eup %2409  ;;  %v960_v3 = vadd.f32 1.0, %v2408_v52  ;;  %2435 = vpow2.f32 %v1136_v0  ;;  %v1333_v19 = vmul.f32 52.0, %v1285_v1  ;;  %v1560_v51 = vmul.f32 %v4605_v27, %v2826_v42  ;;  %v4606_v0 = vld [vmem:[#allocation58_spill] sm:$0xff]  ;;  %v4609_v27 = vld [vmem:[#allocation59_spill] sm:$0xff] }
 0x2cd   :  { %v3651_v5 = vpop.eup %2411  ;;  %4604 = vst [vmem:[#allocation41_spill] sm:$0xff] %v3653_v54  ;;  %2437 = vpow2.f32 %v2065_v37  ;;  %v1334_v55 = vmul.f32 52.0, %v1286_v56  ;;  %v1494_v47 = vmul.f32 52.0, %v1446_v6  ;;  %v1495_v48 = vmul.f32 52.0, %v1447_v7  ;;  %v4608_v37 = vld [vmem:[#allocation18_spill] sm:$0xff]  ;;  %v4610_v6 = vld [vmem:[#allocation16_spill] sm:$0xff] }
 0x2ce   :  { %v2414_v36 = vpop.eup %2413  ;;  %2439 = vrcp.f32 %v960_v3  ;;  %v1496_v52 = vmul.f32 52.0, %v1448_v4  ;;  %v1561_v60 = vmul.f32 %v4606_v0, %v2830_v45  ;;  %v1562_v1 = vmul.f32 %v4608_v37, %v2833_v46  ;;  %v4611_v7 = vld [vmem:[#allocation27_spill] sm:$0xff] }
 0x2cf   :  { %v3657_v26 = vpop.eup %2415  ;;  %v979_v22 = vadd.f32 1.0, %v2414_v36  ;;  %2441 = vpow2.f32 %v1138_v2  ;;  %v1690_v56 = vsel %vm3044_vm8, %v4609_v27, %v4598_v57  ;;  %v1691_v2 = vsel %vm3059_vm9, %v4610_v6, %v4600_v31 }
 0x2d0   :  { %v3661_v54 = vpop.eup %2417  ;;  %v1692_v4 = vsel %vm3088_vm12, %v4611_v7, %v4603_v13  ;;  %v3679_v36 = vmul.f32 %v3574_v14, %v2833_v46  ;;  %v3683_v0 = vmul.f32 %v3574_v14, %v2818_v39  ;;  %v1754_v57 = vsel %vm3072_vm10, %v1560_v51, %v1690_v56 }
 0x2d1   :  { %4607 = vst [vmem:[#allocation42_spill] sm:$0xff] %v3661_v54  ;;  %v2420_v3 = vpop.eup %2419  ;;  %2443 = vrcp.f32 %v979_v22  ;;  %v1755_v27 = vsel %vm3079_vm11, %v1561_v60, %v1691_v2  ;;  %v1756_v13 = vsel %vm3135_vm0, %v1562_v1, %v1692_v4  ;;  %v1818_v6 = vsel %vm3099_vm13, %v1494_v47, %v1754_v57  ;;  %v1229_v60 = vpop.permute.xlu0 %1228 }
 0x2d2   :  { %4612 = vst [vmem:[#allocation37_spill] sm:$0xff] %v3679_v36  ;;  %4613 = vst [vmem:[#allocation46_spill] sm:$0xff] %v3683_v0  ;;  %v3687_v37 = vpop.eup %2421  ;;  %v962_v31 = vadd.f32 1.0, %v2420_v3  ;;  %v1819_v14 = vsel %vm3117_vm14, %v1495_v48, %v1755_v27  ;;  %v1820_v22 = vsel %vm3151_vm2, %v1496_v52, %v1756_v13  ;;  %v1882_v51 = vsel %vm3124_vm15, %v1333_v19, %v1818_v6  ;;  %v670_v3 = vpop.f32.mrf.mxu0  ;;  %v4615_v36 = vld [vmem:[#allocation30_spill] sm:$0xff] }
 0x2d3   :  { %4614 = vst [vmem:[#allocation14_spill] sm:$0xff] %v3687_v37  ;;  %v2424_v7 = vpop.eup %2423  ;;  %v669_v56 = vadd.f32 %v668_v63, %v2789_v28  ;;  %v3704_v1 = vadd.f32 %v3643_v62, %v4615_v36  ;;  %v3708_v47 = vmul.f32 %v3597_v23, %v2815_v38  ;;  %v1883_v48 = vsel %vm3144_vm1, %v1334_v55, %v1819_v14  ;;  %v4617_v63 = vld [vmem:[#allocation56_spill] sm:$0xff]  ;;  %v4618_v14 = vld [vmem:[#allocation55_spill] sm:$0xff] }
 0x2d4   :  { %v2426_v2 = vpop.eup %2425  ;;  %2445 = vrcp.f32 %v962_v31  ;;  %1930 = vst [vmem:[%s4387_s11 + $0x48] sm:$0xff] %v1882_v51  ;;  %v1884_v4 = vsel %vm3169_vm3, %v4617_v63, %v1820_v22  ;;  %1931 = vst [vmem:[%s4387_s11 + $0x50] sm:$0xff] %v1883_v48  ;;  %v671_v55 = vadd.f32 %v670_v3, %v2806_v34  ;;  %v1294_v13 = vadd.f32 %v3612_v17, %v1229_v60  ;;  %v4619_v48 = vld [vmem:[#allocation7_spill] sm:$0xff] }
 0x2d5   :  { %4616 = vst [vmem:[#allocation43_spill] sm:$0xff] %v3704_v1  ;;  %v3715_v19 = vpop.eup %2427  ;;  %v963_v52 = vadd.f32 1.0, %v2426_v2  ;;  %v2067_v57 = vmul.f32 -1.442695, %v669_v56  ;;  %v1142_v31 = vmul.f32 1.442695, %v669_v56  ;;  %v1295_v6 = vadd.f32 %v3657_v26, %v1229_v60 }
 0x2d6   :  { %v3723_v27 = vpop.eup %2429  ;;  %1932 = vst [vmem:[%s4387_s11 + $0x58] sm:$0xff] %v1884_v4  ;;  %v1296_v22 = vadd.f32 %v4618_v14, %v1229_v60  ;;  %v3734_v2 = vmul.f32 %v3651_v5, %v2821_v40  ;;  %v3737_v56 = vmul.f32 %v2424_v7, %v2826_v42  ;;  %v1455_v63 = vadd.f32 %v3612_v17, %v4619_v48 }
 0x2d7   :  { %v2432_v51 = vpop.eup %2431  ;;  %2447 = vrcp.f32 %v963_v52  ;;  %v2068_v36 = vmul.f32 -1.442695, %v671_v55  ;;  %v1144_v0 = vmul.f32 1.442695, %v671_v55  ;;  %v3746_v60 = vmul.f32 %v2424_v7, %v2815_v38 }
 0x2d8   :  { %v3741_v4 = vpop.eup %2433  ;;  %v965_v3 = vadd.f32 1.0, %v2432_v51  ;;  %2449 = vpow2.f32 %v2067_v57  ;;  %v1342_v14 = vmul.f32 52.0, %v1294_v13  ;;  %v1344_v54 = vmul.f32 52.0, %v1296_v22  ;;  %v4625_v51 = vld [vmem:[#allocation8_spill] sm:$0xff] }
 0x2d9   :  { %4620 = vst [vmem:[#allocation11_spill] sm:$0xff] %v3741_v4  ;;  %v3743_v37 = vpop.eup %2435  ;;  %2451 = vpow2.f32 %v1142_v31  ;;  %v1343_v52 = vmul.f32 52.0, %v1295_v6  ;;  %v1456_v1 = vadd.f32 %v3657_v26, %v4619_v48  ;;  %v1503_v11 = vmul.f32 52.0, %v1455_v63 }
 0x2da   :  { %v2438_v39 = vpop.eup %2437  ;;  %2453 = vrcp.f32 %v965_v3  ;;  %v1699_v7 = vsel %vm3044_vm8, %v3555_v50, %v3612_v17  ;;  %v1700_v31 = vsel %vm3059_vm9, %v3649_v9, %v3657_v26  ;;  %v3764_v13 = vmul.f32 %v3723_v27, %v2830_v45  ;;  %v4621_v26 = vld [vmem:[#allocation15_spill] sm:$0xff]  ;;  %v4622_v9 = vld [vmem:[#allocation62_spill] sm:$0xff]  ;;  %v4626_v3 = vld [vmem:[#allocation25_spill] sm:$0xff] }
 0x2db   :  { %v3750_v4 = vpop.eup %2439  ;;  %v966_v57 = vadd.f32 1.0, %v2438_v39  ;;  %2455 = vpow2.f32 %v2068_v36  ;;  %v1504_v6 = vmul.f32 52.0, %v1456_v1  ;;  %v1763_v39 = vsel %vm3072_vm10, %v3552_v61, %v1699_v7  ;;  %v672_v1 = vpop.f32.mrf.mxu0 }
 0x2dc   :  { %v3760_v55 = vpop.eup %2441  ;;  %2457 = vpow2.f32 %v1144_v0  ;;  %v1764_v50 = vsel %vm3079_vm11, %v3646_v59, %v1700_v31  ;;  %v1827_v17 = vsel %vm3099_vm13, %v1503_v11, %v1763_v39  ;;  %v4623_v36 = vsel %vm3151_vm2, %v4621_v26, %v4622_v9  ;;  %v1395_v11 = vpop.permute.xlu1 %1394 }
 0x2dd   :  { %2459 = vrcp.f32 %v966_v57  ;;  %v1893_v0 = vsel %vm3169_vm3, %v1344_v54, %v4623_v36  ;;  %v1828_v61 = vsel %vm3117_vm14, %v1504_v6, %v1764_v50  ;;  %v1891_v59 = vsel %vm3124_vm15, %v1342_v14, %v1827_v17 }
 0x2de   :  { %v3781_v22 = vpop.eup %2443  ;;  %1941 = vst [vmem:[%s4387_s11 + $0xa0] sm:$0xff] %v1893_v0  ;;  %v1291_v48 = vadd.f32 %v3537_v49, %v4625_v51  ;;  %v1292_v54 = vadd.f32 %v3571_v29, %v4625_v51  ;;  %v1892_v63 = vsel %vm3144_vm1, %v1343_v52, %v1828_v61  ;;  %1939 = vst [vmem:[%s4387_s11 + $0x90] sm:$0xff] %v1891_v59  ;;  %v674_v0 = vpop.f32.mrf.mxu0  ;;  %v4627_v59 = vld [vmem:[#allocation61_spill] sm:$0xff] }
 0x2df   :  { %4624 = vst [vmem:[#allocation44_spill] sm:$0xff] %v3781_v22  ;;  %v1293_v14 = vadd.f32 %v4626_v3, %v4625_v51  ;;  %v1452_v57 = vadd.f32 %v3537_v49, %v1395_v11  ;;  %v1453_v7 = vadd.f32 %v3571_v29, %v1395_v11  ;;  %1940 = vst [vmem:[%s4387_s11 + $0x98] sm:$0xff] %v1892_v63 }
 0x2e0   :  { %v1339_v31 = vmul.f32 52.0, %v1291_v48  ;;  %v1340_v6 = vmul.f32 52.0, %v1292_v54  ;;  %v1454_v39 = vadd.f32 %v4626_v3, %v1395_v11  ;;  %v1566_v52 = vmul.f32 %v3409_v53, %v2826_v42  ;;  %v4628_v48 = vld [vmem:[#allocation24_spill] sm:$0xff] }
 0x2e1   :  { %v3809_v50 = vpop.eup %2445  ;;  %v1341_v17 = vmul.f32 52.0, %v1293_v14  ;;  %v1500_v26 = vmul.f32 52.0, %v1452_v57  ;;  %v1501_v9 = vmul.f32 52.0, %v1453_v7  ;;  %v1567_v36 = vmul.f32 %v3452_v44, %v2830_v45 }
 0x2e2   :  { %v1502_v61 = vmul.f32 52.0, %v1454_v39  ;;  %v1568_v51 = vmul.f32 %v4627_v59, %v2833_v46  ;;  %v1696_v11 = vsel %vm3044_vm8, %v3521_v10, %v3537_v49  ;;  %v1697_v53 = vsel %vm3059_vm9, %v3535_v20, %v3571_v29 }
 0x2e3   :  { %v1698_v44 = vsel %vm3088_vm12, %v4628_v48, %v4626_v3  ;;  %v1760_v54 = vsel %vm3072_vm10, %v1566_v52, %v1696_v11  ;;  %v1761_v63 = vsel %vm3079_vm11, %v1567_v36, %v1697_v53  ;;  %v673_v14 = vadd.f32 %v672_v1, %v2789_v28  ;;  %v4629_v53 = vld [vmem:[#allocation10_spill] sm:$0xff] }
 0x2e4   :  { %v3832_v57 = vpop.eup %2447  ;;  %v1762_v10 = vsel %vm3135_vm0, %v1568_v51, %v1698_v44  ;;  %v1824_v29 = vsel %vm3099_vm13, %v1500_v26, %v1760_v54  ;;  %v1825_v20 = vsel %vm3117_vm14, %v1501_v9, %v1761_v63  ;;  %v675_v49 = vadd.f32 %v674_v0, %v2806_v34 }
 0x2e5   :  { %v2450_v3 = vpop.eup %2449  ;;  %v1826_v7 = vsel %vm3151_vm2, %v1502_v61, %v1762_v10  ;;  %v1888_v1 = vsel %vm3124_vm15, %v1339_v31, %v1824_v29  ;;  %v1889_v39 = vsel %vm3144_vm1, %v1340_v6, %v1825_v20  ;;  %v2070_v52 = vmul.f32 -1.442695, %v673_v14  ;;  %v1403_v31 = vpop.permute.xlu1 %1402  ;;  %v4630_v10 = vld [vmem:[#allocation2_spill] sm:$0xff] }
 0x2e6   :  { %v2452_v36 = vpop.eup %2451  ;;  %v968_v59 = vadd.f32 1.0, %v2450_v3  ;;  %v1890_v26 = vsel %vm3169_vm3, %v1341_v17, %v1826_v7  ;;  %1936 = vst [vmem:[%s4387_s11 + $0x78] sm:$0xff] %v1888_v1  ;;  %1937 = vst [vmem:[%s4387_s11 + $0x80] sm:$0xff] %v1889_v39  ;;  %v1148_v9 = vmul.f32 1.442695, %v673_v14  ;;  %v3859_v6 = vmul.f32 %v3723_v27, %v2821_v40 }
 0x2e7   :  { %v2071_v0 = vmul.f32 -1.442695, %v675_v49  ;;  %v3855_v61 = vpop.eup %2453  ;;  %v3863_v17 = vmul.f32 %v3743_v37, %v2815_v38  ;;  %v3867_v51 = vmul.f32 %v3760_v55, %v2821_v40  ;;  %1938 = vst [vmem:[%s4387_s11 + $0x88] sm:$0xff] %v1890_v26  ;;  %2461 = vpow2.f32 %v2070_v52 }
 0x2e8   :  { %v2456_v11 = vpop.eup %2455  ;;  %2463 = vrcp.f32 %v968_v59  ;;  %v1297_v48 = vadd.f32 %v3715_v19, %v4629_v53  ;;  %v1298_v27 = vadd.f32 %v3750_v4, %v4629_v53  ;;  %v1458_v44 = vadd.f32 %v3715_v19, %v1403_v31  ;;  %v4631_v53 = vld [vmem:[#allocation54_spill] sm:$0xff] }
 0x2e9   :  { %v3877_v54 = vpop.eup %2457  ;;  %v969_v63 = vadd.f32 1.0, %v2456_v11  ;;  %2465 = vpow2.f32 %v1148_v9  ;;  %v1459_v14 = vadd.f32 %v3750_v4, %v1403_v31  ;;  %v1460_v29 = vadd.f32 %v4630_v10, %v1403_v31 }
 0x2ea   :  { %v3881_v20 = vpop.eup %2459  ;;  %v3884_v3 = vmul.f32 %v2452_v36, %v2826_v42  ;;  %v3887_v7 = vmul.f32 %v2452_v36, %v2815_v38  ;;  %2467 = vpow2.f32 %v2071_v0  ;;  %v3889_v1 = vmul.f32 1.442695, %v675_v49  ;;  %v4632_v0 = vld [vmem:[#allocation60_spill] sm:$0xff] }
 0x2eb   :  { %2469 = vrcp.f32 %v969_v63  ;;  %v1345_v39 = vmul.f32 52.0, %v1297_v48  ;;  %v1506_v52 = vmul.f32 52.0, %v1458_v44  ;;  %v1507_v59 = vmul.f32 52.0, %v1459_v14  ;;  %v1239_v48 = vpop.permute.xlu0 %1238 }
 0x2ec   :  { %v1346_v26 = vmul.f32 52.0, %v1298_v27  ;;  %v1508_v9 = vmul.f32 52.0, %v1460_v29  ;;  %v1572_v31 = vmul.f32 %v3597_v23, %v2826_v42  ;;  %v1573_v11 = vmul.f32 %v3651_v5, %v2830_v45 }
 0x2ed   :  { %v1574_v22 = vmul.f32 %v4631_v53, %v2833_v46  ;;  %v1702_v49 = vsel %vm3044_vm8, %v3708_v47, %v3715_v19  ;;  %v1703_v36 = vsel %vm3059_vm9, %v3734_v2, %v3750_v4  ;;  %v1704_v23 = vsel %vm3088_vm12, %v4632_v0, %v4630_v10  ;;  %v678_v19 = vpop.f32.mrf.mxu0 }
 0x2ee   :  { %v1766_v5 = vsel %vm3072_vm10, %v1572_v31, %v1702_v49  ;;  %v1767_v27 = vsel %vm3079_vm11, %v1573_v11, %v1703_v36  ;;  %v1300_v44 = vadd.f32 %v3809_v50, %v1239_v48  ;;  %v1301_v47 = vadd.f32 %v3832_v57, %v1239_v48  ;;  %v4633_v11 = vld [vmem:[#allocation9_spill] sm:$0xff] }
 0x2ef   :  { %v1768_v2 = vsel %vm3135_vm0, %v1574_v22, %v1704_v23  ;;  %v1830_v4 = vsel %vm3099_vm13, %v1506_v52, %v1766_v5  ;;  %v1831_v63 = vsel %vm3117_vm14, %v1507_v59, %v1767_v27  ;;  %v1302_v14 = vadd.f32 %v3500_v43, %v1239_v48  ;;  %v680_v36 = vpop.f32.mrf.mxu0  ;;  %v4634_v48 = vld [vmem:[#allocation34_spill] sm:$0xff] }
 0x2f0   :  { %v3924_v10 = vmul.f32 %v3877_v54, %v2830_v45  ;;  %v1832_v29 = vsel %vm3151_vm2, %v1508_v9, %v1768_v2  ;;  %v1894_v31 = vsel %vm3124_vm15, %v1345_v39, %v1830_v4  ;;  %v1895_v22 = vsel %vm3144_vm1, %v1346_v26, %v1831_v63  ;;  %v4635_v4 = vld [vmem:[#allocation28_spill] sm:$0xff] }
 0x2f1   :  { %v1896_v52 = vsel %vm3169_vm3, %v3485_v25, %v1832_v29  ;;  %1942 = vst [vmem:[%s4387_s11 + $0xa8] sm:$0xff] %v1894_v31  ;;  %1943 = vst [vmem:[%s4387_s11 + $0xb0] sm:$0xff] %v1895_v22  ;;  %v1348_v59 = vmul.f32 52.0, %v1300_v44  ;;  %v1349_v9 = vmul.f32 52.0, %v1301_v47  ;;  %v1461_v39 = vadd.f32 %v3809_v50, %v4633_v11 }
 0x2f2   :  { %1944 = vst [vmem:[%s4387_s11 + $0xb8] sm:$0xff] %v1896_v52  ;;  %v1462_v25 = vadd.f32 %v3832_v57, %v4633_v11  ;;  %v1463_v26 = vadd.f32 %v3500_v43, %v4633_v11  ;;  %v1705_v53 = vsel %vm3044_vm8, %v3746_v60, %v3809_v50  ;;  %v1706_v49 = vsel %vm3059_vm9, %v3859_v6, %v3832_v57 }
 0x2f3   :  { %v1350_v0 = vmul.f32 52.0, %v1302_v14  ;;  %v1509_v23 = vmul.f32 52.0, %v1461_v39  ;;  %v1707_v5 = vsel %vm3088_vm12, %v4634_v48, %v3500_v43  ;;  %v1769_v27 = vsel %vm3072_vm10, %v3737_v56, %v1705_v53  ;;  %v4636_v39 = vld [vmem:[#allocation13_spill] sm:$0xff] }
 0x2f4   :  { %v2462_v44 = vpop.eup %2461  ;;  %v1510_v47 = vmul.f32 52.0, %v1462_v25  ;;  %v1511_v60 = vmul.f32 52.0, %v1463_v26  ;;  %v1770_v50 = vsel %vm3079_vm11, %v3764_v13, %v1706_v49  ;;  %v679_v57 = vadd.f32 %v678_v19, %v2789_v28 }
 0x2f5   :  { %v3969_v6 = vpop.eup %2463  ;;  %v971_v2 = vadd.f32 1.0, %v2462_v44  ;;  %v1771_v43 = vsel %vm3135_vm0, %v4635_v4, %v1707_v5  ;;  %v1833_v63 = vsel %vm3099_vm13, %v1509_v23, %v1769_v27  ;;  %v681_v56 = vadd.f32 %v680_v36, %v2806_v34  ;;  %v1411_v36 = vpop.permute.xlu1 %1410 }
 0x2f6   :  { %v3977_v14 = vpop.eup %2465  ;;  %v1834_v29 = vsel %vm3117_vm14, %v1510_v47, %v1770_v50  ;;  %v1835_v13 = vsel %vm3151_vm2, %v1511_v60, %v1771_v43  ;;  %v1897_v19 = vsel %vm3124_vm15, %v1348_v59, %v1833_v63  ;;  %v2073_v31 = vmul.f32 -1.442695, %v679_v57  ;;  %v4637_v63 = vld [vmem:[#allocation23_spill] sm:$0xff] }
 0x2f7   :  { %v2468_v22 = vpop.eup %2467  ;;  %2471 = vrcp.f32 %v971_v2  ;;  %v1898_v52 = vsel %vm3144_vm1, %v1349_v9, %v1834_v29  ;;  %v1899_v11 = vsel %vm3169_vm3, %v1350_v0, %v1835_v13  ;;  %1945 = vst [vmem:[%s4387_s11 + $0xc0] sm:$0xff] %v1897_v19  ;;  %v1303_v25 = vadd.f32 %v3855_v61, %v4636_v39  ;;  %v1249_v29 = vpop.permute.xlu0 %1248 }
 0x2f8   :  { %v3994_v26 = vpop.eup %2469  ;;  %v972_v53 = vadd.f32 1.0, %v2468_v22  ;;  %1946 = vst [vmem:[%s4387_s11 + $0xc8] sm:$0xff] %v1898_v52  ;;  %1947 = vst [vmem:[%s4387_s11 + $0xd0] sm:$0xff] %v1899_v11  ;;  %2473 = vpow2.f32 %v2073_v31  ;;  %v1154_v59 = vmul.f32 1.442695, %v679_v57  ;;  %v1648_v49 = vmul.f32 %v3877_v54, %v2821_v40  ;;  %v682_v57 = vpop.f32.mrf.mxu0  ;;  %v4638_v31 = vld [vmem:[#allocation31_spill] sm:$0xff] }
 0x2f9   :  { %v2074_v9 = vmul.f32 -1.442695, %v681_v56  ;;  %2475 = vpow2.f32 %v3889_v1  ;;  %v1304_v0 = vadd.f32 %v3881_v20, %v4636_v39  ;;  %v1305_v23 = vadd.f32 %v3588_v58, %v4636_v39  ;;  %v4639_v11 = vld [vmem:[#allocation39_spill] sm:$0xff] }
 0x2fa   :  { %2477 = vrcp.f32 %v972_v53  ;;  %v1156_v48 = vmul.f32 1.442695, %v681_v56  ;;  %v1464_v5 = vadd.f32 %v3855_v61, %v1411_v36  ;;  %v1465_v27 = vadd.f32 %v3881_v20, %v1411_v36 }
 0x2fb   :  { %2479 = vpow2.f32 %v1154_v59  ;;  %v1351_v44 = vmul.f32 52.0, %v1303_v25  ;;  %v1352_v47 = vmul.f32 52.0, %v1304_v0  ;;  %v1466_v54 = vadd.f32 %v3588_v58, %v1411_v36  ;;  %v684_v25 = vpop.f32.mrf.mxu0 }
 0x2fc   :  { %2481 = vpow2.f32 %v2074_v9  ;;  %v1353_v1 = vmul.f32 52.0, %v1305_v23  ;;  %v1512_v60 = vmul.f32 52.0, %v1464_v5  ;;  %v1513_v50 = vmul.f32 52.0, %v1465_v27  ;;  %v4640_v5 = vld [vmem:[#allocation12_spill] sm:$0xff] }
 0x2fd   :  { %v1514_v2 = vmul.f32 52.0, %v1466_v54  ;;  %v1578_v4 = vmul.f32 %v3743_v37, %v2826_v42  ;;  %v1579_v43 = vmul.f32 %v3760_v55, %v2830_v45  ;;  %v1580_v56 = vmul.f32 %v4637_v63, %v2833_v46 }
 0x2fe   :  { %v1708_v13 = vsel %vm3044_vm8, %v3863_v17, %v3855_v61  ;;  %v1709_v19 = vsel %vm3059_vm9, %v3867_v51, %v3881_v20  ;;  %v1710_v37 = vsel %vm3088_vm12, %v4638_v31, %v3588_v58  ;;  %v1306_v55 = vadd.f32 %v3969_v6, %v1249_v29 }
 0x2ff   :  { %v1772_v22 = vsel %vm3072_vm10, %v1578_v4, %v1708_v13  ;;  %v1773_v52 = vsel %vm3079_vm11, %v1579_v43, %v1709_v19  ;;  %v1774_v61 = vsel %vm3135_vm0, %v1580_v56, %v1710_v37  ;;  %v1307_v17 = vadd.f32 %v3994_v26, %v1249_v29 }
 0x300   :  { %v1836_v51 = vsel %vm3099_vm13, %v1512_v60, %v1772_v22  ;;  %v1837_v20 = vsel %vm3117_vm14, %v1513_v50, %v1773_v52  ;;  %v1838_v58 = vsel %vm3151_vm2, %v1514_v2, %v1774_v61  ;;  %v1308_v39 = vadd.f32 %v4639_v11, %v1249_v29  ;;  %v4641_v2 = vld [vmem:[#allocation40_spill] sm:$0xff]  ;;  %v1419_v52 = vpop.permute.xlu1 %1418  ;;  %v4645_v61 = vld [vmem:[#allocation22_spill] sm:$0xff] }
 0x301   :  { %v1900_v53 = vsel %vm3124_vm15, %v1351_v44, %v1836_v51  ;;  %v1901_v59 = vsel %vm3144_vm1, %v1352_v47, %v1837_v20  ;;  %v1902_v9 = vsel %vm3169_vm3, %v1353_v1, %v1838_v58  ;;  %v1354_v36 = vmul.f32 52.0, %v1306_v55 }
 0x302   :  { %1948 = vst [vmem:[%s4387_s11 + $0xd8] sm:$0xff] %v1900_v53  ;;  %1949 = vst [vmem:[%s4387_s11 + $0xe0] sm:$0xff] %v1901_v59  ;;  %v1355_v0 = vmul.f32 52.0, %v1307_v17  ;;  %v1356_v23 = vmul.f32 52.0, %v1308_v39  ;;  %v1467_v27 = vadd.f32 %v3969_v6, %v4640_v5  ;;  %v1468_v44 = vadd.f32 %v3994_v26, %v4640_v5  ;;  %v4647_v59 = vld [vmem:[#allocation33_spill] sm:$0xff] }
 0x303   :  { %1950 = vst [vmem:[%s4387_s11 + $0xe8] sm:$0xff] %v1902_v9  ;;  %v1711_v47 = vsel %vm3044_vm8, %v3887_v7, %v3969_v6  ;;  %v1712_v54 = vsel %vm3059_vm9, %v1648_v49, %v3994_v26  ;;  %v683_v1 = vadd.f32 %v682_v57, %v2789_v28  ;;  %v4073_v60 = vadd.f32 %v684_v25, %v2806_v34  ;;  %v4642_v26 = vld [vmem:[#allocation26_spill] sm:$0xff]  ;;  %v4646_v25 = vld [vmem:[#allocation43_spill] sm:$0xff] }
 0x304   :  { %v2472_v50 = vpop.eup %2471  ;;  %v1725_v4 = vsel %vm3088_vm12, %v4641_v2, %v3643_v62  ;;  %2483 = vpow2.f32 %v1156_v48  ;;  %v1515_v43 = vmul.f32 52.0, %v1467_v27  ;;  %v1516_v63 = vmul.f32 52.0, %v1468_v44  ;;  %v4643_v49 = vld [vmem:[#allocation38_spill] sm:$0xff] }
 0x305   :  { %v2474_v56 = vpop.eup %2473  ;;  %v1775_v7 = vsel %vm3072_vm10, %v3884_v3, %v1711_v47  ;;  %v1776_v6 = vsel %vm3079_vm11, %v3924_v10, %v1712_v54  ;;  %v4644_v57 = vsel %vm3151_vm2, %v4642_v26, %v4643_v49  ;;  %v2076_v48 = vmul.f32 -1.442695, %v683_v1  ;;  %v4650_v47 = vld [vmem:[#allocation4_spill] sm:$0xff] }
 0x306   :  { %v1905_v29 = vsel %vm3169_vm3, %v1356_v23, %v4644_v57  ;;  %v2476_v13 = vpop.eup %2475  ;;  %v974_v19 = vadd.f32 1.0, %v2474_v56  ;;  %v1839_v31 = vsel %vm3099_vm13, %v1515_v43, %v1775_v7  ;;  %v1840_v3 = vsel %vm3117_vm14, %v1516_v63, %v1776_v6  ;;  %v688_v7 = vpop.f32.mrf.mxu0  ;;  %v4651_v57 = vld [vmem:[#allocation35_spill] sm:$0xff] }
 0x307   :  { %1953 = vst [vmem:[%s4387_s11 + $0x100] sm:$0xff] %v1905_v29  ;;  %v2077_v10 = vmul.f32 -1.442695, %v4073_v60  ;;  %v2478_v37 = vpop.eup %2477  ;;  %v1903_v55 = vsel %vm3124_vm15, %v1354_v36, %v1839_v31  ;;  %v1904_v22 = vsel %vm3144_vm1, %v1355_v0, %v1840_v3  ;;  %2485 = vpow2.f32 %v2076_v48  ;;  %v4648_v36 = vld [vmem:[#allocation3_spill] sm:$0xff]  ;;  %v4649_v0 = vld [vmem:[#allocation42_spill] sm:$0xff]  ;;  %v4652_v31 = vld [vmem:[#allocation29_spill] sm:$0xff] }
 0x308   :  { %v1309_v17 = vadd.f32 %v2472_v50, %v4645_v61  ;;  %v2480_v51 = vpop.eup %2479  ;;  %2487 = vrcp.f32 %v974_v19  ;;  %1951 = vst [vmem:[%s4387_s11 + $0xf0] sm:$0xff] %v1903_v55  ;;  %1952 = vst [vmem:[%s4387_s11 + $0xf8] sm:$0xff] %v1904_v22  ;;  %v1310_v20 = vadd.f32 %v2478_v37, %v4645_v61  ;;  %v1470_v58 = vadd.f32 %v2472_v50, %v1419_v52  ;;  %v4137_v19 = vpop.permute.xlu0 %1258  ;;  %v4654_v55 = vld [vmem:[#allocation17_spill] sm:$0xff]  ;;  %v4655_v61 = vld [vmem:[#allocation46_spill] sm:$0xff] }
 0x309   :  { %v1471_v11 = vadd.f32 %v2478_v37, %v1419_v52  ;;  %v2482_v39 = vpop.eup %2481  ;;  %v4113_v53 = vmul.f32 52.0, %v4646_v25  ;;  %v4118_v9 = vsel %vm3135_vm0, %v4647_v59, %v1725_v4  ;;  %v4122_v23 = vmul.f32 %v4649_v0, %v4648_v36 }
 0x30a   :  { %v1650_v5 = vmul.f32 %v3977_v14, %v2815_v38  ;;  %v1651_v27 = vmul.f32 %v2476_v13, %v2821_v40  ;;  %v975_v44 = vadd.f32 1.0, %v2482_v39  ;;  %2489 = vpow2.f32 %v2077_v10 }
 0x30b   :  { %v1472_v54 = vadd.f32 %v4650_v47, %v1419_v52  ;;  %v1160_v2 = vmul.f32 1.442695, %v683_v1  ;;  %v1357_v43 = vmul.f32 52.0, %v1309_v17  ;;  %v1358_v63 = vmul.f32 52.0, %v1310_v20  ;;  %v690_v20 = vpop.f32.mrf.mxu0 }
 0x30c   :  { %v1518_v56 = vmul.f32 52.0, %v1470_v58  ;;  %2491 = vrcp.f32 %v975_v44  ;;  %v1519_v4 = vmul.f32 52.0, %v1471_v11  ;;  %v1584_v26 = vmul.f32 %v3977_v14, %v2826_v42  ;;  %v4656_v44 = vld [vmem:[#allocation41_spill] sm:$0xff] }
 0x30d   :  { %v1520_v6 = vmul.f32 52.0, %v1472_v54  ;;  %v1585_v49 = vmul.f32 %v2476_v13, %v2830_v45  ;;  %v1586_v29 = vmul.f32 %v4651_v57, %v2833_v46  ;;  %v1714_v48 = vsel %vm3044_vm8, %v1650_v5, %v2472_v50  ;;  %v4653_v13 = vld [vmem:[#allocation14_spill] sm:$0xff]  ;;  %v4658_v57 = vld [vmem:[#allocation44_spill] sm:$0xff] }
 0x30e   :  { %v1715_v1 = vsel %vm3059_vm9, %v1651_v27, %v2478_v37  ;;  %v1716_v3 = vsel %vm3088_vm12, %v4652_v31, %v4650_v47  ;;  %v1778_v14 = vsel %vm3072_vm10, %v1584_v26, %v1714_v48  ;;  %v1314_v10 = vadd.f32 %v4653_v13, %v4137_v19 }
 0x30f   :  { %v1475_v22 = vadd.f32 %v4653_v13, %v4654_v55  ;;  %v1779_v50 = vsel %vm3079_vm11, %v1585_v49, %v1715_v1  ;;  %v1780_v37 = vsel %vm3135_vm0, %v1586_v29, %v1716_v3  ;;  %v1842_v52 = vsel %vm3099_vm13, %v1518_v56, %v1778_v14  ;;  %v4659_v3 = vld [vmem:[#allocation36_spill] sm:$0xff] }
 0x310   :  { %v1719_v17 = vsel %vm3088_vm12, %v4655_v61, %v4653_v13  ;;  %v1843_v58 = vsel %vm3117_vm14, %v1519_v4, %v1779_v50  ;;  %v1844_v11 = vsel %vm3151_vm2, %v1520_v6, %v1780_v37  ;;  %v1906_v39 = vsel %vm3124_vm15, %v1357_v43, %v1842_v52  ;;  %v4188_v6 = vpop.permute.xlu1 %1426  ;;  %v692_v61 = vpop.f32.mrf.mxu0 }
 0x311   :  { %v1362_v25 = vmul.f32 52.0, %v1314_v10  ;;  %v2484_v59 = vpop.eup %2483  ;;  %v1162_v5 = vmul.f32 1.442695, %v4073_v60  ;;  %v1907_v27 = vsel %vm3144_vm1, %v1358_v63, %v1843_v58  ;;  %v1908_v47 = vsel %vm3169_vm3, %v4656_v44, %v1844_v11  ;;  %1954 = vst [vmem:[%s4387_s11 + $0x108] sm:$0xff] %v1906_v39  ;;  %v4657_v60 = vld [vmem:[#allocation37_spill] sm:$0xff] }
 0x312   :  { %v1523_v54 = vmul.f32 52.0, %v1475_v22  ;;  %v1587_v56 = vmul.f32 %v2480_v51, %v2826_v42  ;;  %1955 = vst [vmem:[%s4387_s11 + $0x110] sm:$0xff] %v1907_v27  ;;  %1956 = vst [vmem:[%s4387_s11 + $0x118] sm:$0xff] %v1908_v47  ;;  %v1783_v43 = vsel %vm3135_vm0, %v4657_v60, %v1719_v17  ;;  %v689_v63 = vadd.f32 %v688_v7, %v2789_v28  ;;  %v4208_v22 = vpop.permute.xlu0 %1268 }
 0x313   :  { %v4186_v4 = vadd.f32 %v690_v20, %v2806_v34  ;;  %v1653_v26 = vmul.f32 %v2480_v51, %v2815_v38  ;;  %2493 = vpow2.f32 %v1160_v2  ;;  %v1478_v29 = vadd.f32 %v4658_v57, %v4188_v6 }
 0x314   :  { %v1847_v49 = vsel %vm3151_vm2, %v1523_v54, %v1783_v43  ;;  %v2486_v48 = vpop.eup %2485  ;;  %v1588_v1 = vmul.f32 %v2484_v59, %v2830_v45  ;;  %v2079_v31 = vmul.f32 -1.442695, %v689_v63  ;;  %v1317_v14 = vadd.f32 %v4658_v57, %v4659_v3  ;;  %v694_v43 = vpop.f32.mrf.mxu0 }
 0x315   :  { %v1911_v7 = vsel %vm3169_vm3, %v1362_v25, %v1847_v49  ;;  %v2488_v13 = vpop.eup %2487  ;;  %v977_v10 = vadd.f32 1.0, %v2486_v48  ;;  %2495 = vpow2.f32 %v1162_v5  ;;  %v2080_v51 = vmul.f32 -1.442695, %v4186_v4 }
 0x316   :  { %1959 = vst [vmem:[%s4387_s11 + $0x130] sm:$0xff] %v1911_v7  ;;  %v1722_v2 = vsel %vm3088_vm12, %v4122_v23, %v4658_v57  ;;  %v1312_v50 = vadd.f32 %v2488_v13, %v4137_v19  ;;  %v1473_v37 = vadd.f32 %v2488_v13, %v4654_v55  ;;  %v1717_v52 = vsel %vm3044_vm8, %v1653_v26, %v2488_v13  ;;  %v4227_v26 = vpop.permute.xlu1 %1434 }
 0x317   :  { %2497 = vpow2.f32 %v2079_v31  ;;  %v2490_v17 = vpop.eup %2489  ;;  %v1654_v20 = vmul.f32 %v2484_v59, %v2821_v40  ;;  %v1526_v58 = vmul.f32 52.0, %v1478_v29  ;;  %v1592_v11 = vmul.f32 %v4649_v0, %v2833_v46  ;;  %v4660_v31 = vld [vmem:[#allocation11_spill] sm:$0xff] }
 0x318   :  { %2499 = vrcp.f32 %v977_v10  ;;  %v978_v23 = vadd.f32 1.0, %v2490_v17  ;;  %v1360_v39 = vmul.f32 52.0, %v1312_v50  ;;  %v1521_v25 = vmul.f32 52.0, %v1473_v37 }
 0x319   :  { %v1365_v5 = vmul.f32 52.0, %v1317_v14  ;;  %v2492_v27 = vpop.eup %2491  ;;  %v1781_v44 = vsel %vm3072_vm10, %v1587_v56, %v1717_v52  ;;  %2501 = vpow2.f32 %v2080_v51  ;;  %v1786_v47 = vsel %vm3135_vm0, %v1592_v11, %v1722_v2  ;;  %v4661_v51 = vld [vmem:[#allocation32_spill] sm:$0xff] }
 0x31a   :  { %v1320_v59 = vadd.f32 %v3643_v62, %v4208_v22  ;;  %2503 = vrcp.f32 %v978_v23  ;;  %v1313_v54 = vadd.f32 %v2492_v27, %v4137_v19  ;;  %v1474_v0 = vadd.f32 %v2492_v27, %v4654_v55  ;;  %v4239_v55 = vpop.permute.xlu0 %1273 }
 0x31b   :  { %v1718_v60 = vsel %vm3059_vm9, %v1654_v20, %v2492_v27  ;;  %v1853_v56 = vsel %vm3151_vm2, %v4113_v53, %v4118_v9  ;;  %v1845_v62 = vsel %vm3099_vm13, %v1521_v25, %v1781_v44  ;;  %v1850_v19 = vsel %vm3151_vm2, %v1526_v58, %v1786_v47 }
 0x31c   :  { %v1782_v49 = vsel %vm3079_vm11, %v1588_v1, %v1718_v60  ;;  %v1361_v57 = vmul.f32 52.0, %v1313_v54  ;;  %v1522_v29 = vmul.f32 52.0, %v1474_v0  ;;  %v1909_v48 = vsel %vm3124_vm15, %v1360_v39, %v1845_v62 }
 0x31d   :  { %v1914_v7 = vsel %vm3169_vm3, %v1365_v5, %v1850_v19  ;;  %1957 = vst [vmem:[%s4387_s11 + $0x120] sm:$0xff] %v1909_v48  ;;  %v1368_v53 = vmul.f32 52.0, %v1320_v59  ;;  %v693_v9 = vadd.f32 %v692_v61, %v2789_v28  ;;  %v695_v1 = vadd.f32 %v694_v43, %v2806_v34 }
 0x31e   :  { %1962 = vst [vmem:[%s4387_s11 + $0x148] sm:$0xff] %v1914_v7  ;;  %v1484_v14 = vadd.f32 %v4660_v31, %v4227_v26  ;;  %v1846_v13 = vsel %vm3117_vm14, %v1522_v29, %v1782_v49  ;;  %v1166_v10 = vmul.f32 1.442695, %v689_v63  ;;  %v1664_v2 = vmul.f32 %v4661_v51, %v4648_v36 }
 0x31f   :  { %v1323_v50 = vadd.f32 %v4660_v31, %v4239_v55  ;;  %v1910_v37 = vsel %vm3144_vm1, %v1361_v57, %v1846_v13  ;;  %v1917_v28 = vsel %vm3169_vm3, %v1368_v53, %v1853_v56  ;;  %v2082_v34 = vmul.f32 -1.442695, %v693_v9 }
 0x320   :  { %v1598_v52 = vmul.f32 %v4661_v51, %v2833_v46  ;;  %v2494_v61 = vpop.eup %2493  ;;  %1958 = vst [vmem:[%s4387_s11 + $0x128] sm:$0xff] %v1910_v37  ;;  %1965 = vst [vmem:[%s4387_s11 + $0x160] sm:$0xff] %v1917_v28  ;;  %v2083_v36 = vmul.f32 -1.442695, %v695_v1  ;;  %v1532_v63 = vmul.f32 52.0, %v1484_v14  ;;  %v1728_v17 = vsel %vm3088_vm12, %v1664_v2, %v4660_v31 }
 0x321   :  { %v1168_v20 = vmul.f32 1.442695, %v4186_v4  ;;  %2505 = vpow2.f32 %v2082_v34  ;;  %v1371_v58 = vmul.f32 52.0, %v1323_v50  ;;  %v1656_v16 = vmul.f32 %v2494_v61, %v2815_v38  ;;  %v4662_v34 = vld [vmem:[#allocation30_spill] sm:$0xff] }
 0x322   :  { %v1792_v46 = vsel %vm3135_vm0, %v1598_v52, %v1728_v17  ;;  %v2496_v11 = vpop.eup %2495  ;;  %2507 = vpow2.f32 %v1166_v10  ;;  %v1590_v60 = vmul.f32 %v2494_v61, %v2826_v42  ;;  %v1172_v57 = vmul.f32 1.442695, %v693_v9 }
 0x323   :  { %v1856_v23 = vsel %vm3151_vm2, %v1532_v63, %v1792_v46  ;;  %2509 = vpow2.f32 %v2083_v36  ;;  %v1657_v44 = vmul.f32 %v2496_v11, %v2821_v40  ;;  %v1591_v62 = vmul.f32 %v2496_v11, %v2830_v45 }
 0x324   :  { %v2498_v39 = vpop.eup %2497  ;;  %v1920_v25 = vsel %vm3169_vm3, %v1371_v58, %v1856_v23  ;;  %2511 = vpow2.f32 %v1168_v20  ;;  %v1174_v53 = vmul.f32 1.442695, %v695_v1 }
 0x325   :  { %v2500_v5 = vpop.eup %2499  ;;  %v980_v27 = vadd.f32 1.0, %v2498_v39  ;;  %1968 = vst [vmem:[%s4387_s11 + $0x178] sm:$0xff] %v1920_v25 }
 0x326   :  { %v1315_v18 = vadd.f32 %v2500_v5, %v4659_v3  ;;  %v1476_v4 = vadd.f32 %v2500_v5, %v4188_v6  ;;  %v2502_v33 = vpop.eup %2501  ;;  %v1720_v35 = vsel %vm3044_vm8, %v1656_v16, %v2500_v5 }
 0x327   :  { %2513 = vrcp.f32 %v980_v27  ;;  %v2504_v47 = vpop.eup %2503  ;;  %v981_v59 = vadd.f32 1.0, %v2502_v33  ;;  %v1784_v19 = vsel %vm3072_vm10, %v1590_v60, %v1720_v35 }
 0x328   :  { %v1363_v54 = vmul.f32 52.0, %v1315_v18  ;;  %v1524_v0 = vmul.f32 52.0, %v1476_v4  ;;  %v1316_v43 = vadd.f32 %v2504_v47, %v4659_v3  ;;  %v1477_v56 = vadd.f32 %v2504_v47, %v4188_v6 }
 0x329   :  { %v1721_v49 = vsel %vm3059_vm9, %v1657_v44, %v2504_v47  ;;  %2515 = vrcp.f32 %v981_v59 }
 0x32a   :  { %v1364_v29 = vmul.f32 52.0, %v1316_v43  ;;  %v1525_v48 = vmul.f32 52.0, %v1477_v56  ;;  %v1848_v7 = vsel %vm3099_vm13, %v1524_v0, %v1784_v19  ;;  %v1785_v3 = vsel %vm3079_vm11, %v1591_v62, %v1721_v49 }
 0x32b   :  { %v1912_v6 = vsel %vm3124_vm15, %v1363_v54, %v1848_v7  ;;  %2517 = vpow2.f32 %v1172_v57 }
 0x32c   :  { %v1849_v31 = vsel %vm3117_vm14, %v1525_v48, %v1785_v3  ;;  %1960 = vst [vmem:[%s4387_s11 + $0x138] sm:$0xff] %v1912_v6  ;;  %2519 = vpow2.f32 %v1174_v53 }
 0x32d   :  { %v1913_v9 = vsel %vm3144_vm1, %v1364_v29, %v1849_v31 }
 0x32e   :  { %v2506_v14 = vpop.eup %2505  ;;  %1961 = vst [vmem:[%s4387_s11 + $0x140] sm:$0xff] %v1913_v9 }
 0x32f   :  { %v2508_v13 = vpop.eup %2507  ;;  %v983_v10 = vadd.f32 1.0, %v2506_v14 }
 0x330   :  { %v2510_v1 = vpop.eup %2509  ;;  %v1659_v50 = vmul.f32 %v2508_v13, %v2815_v38  ;;  %v1593_v36 = vmul.f32 %v2508_v13, %v2826_v42 }
 0x331   :  { %2521 = vrcp.f32 %v983_v10  ;;  %v984_v51 = vadd.f32 1.0, %v2510_v1  ;;  %v2512_v2 = vpop.eup %2511 }
 0x332   :  { %v1660_v63 = vmul.f32 %v2512_v2, %v2821_v40  ;;  %v1594_v25 = vmul.f32 %v2512_v2, %v2830_v45 }
 0x333   :  { %2523 = vrcp.f32 %v984_v51 }
 0x334   :  { %v2514_v37 = vpop.eup %2513 }
 0x335   :  { %v1318_v28 = vadd.f32 %v2514_v37, %v4208_v22  ;;  %v1479_v52 = vadd.f32 %v2514_v37, %v4662_v34  ;;  %v1723_v61 = vsel %vm3044_vm8, %v1659_v50, %v2514_v37 }
 0x336   :  { %v2516_v17 = vpop.eup %2515  ;;  %v1787_v39 = vsel %vm3072_vm10, %v1593_v36, %v1723_v61 }
 0x337   :  { %v1366_v20 = vmul.f32 52.0, %v1318_v28  ;;  %v1527_v46 = vmul.f32 52.0, %v1479_v52  ;;  %v1319_v58 = vadd.f32 %v2516_v17, %v4208_v22  ;;  %v1480_v11 = vadd.f32 %v2516_v17, %v4662_v34 }
 0x338   :  { %v1724_v23 = vsel %vm3059_vm9, %v1660_v63, %v2516_v17  ;;  %v2518_v4 = vpop.eup %2517 }
 0x339   :  { %v1851_v5 = vsel %vm3099_vm13, %v1527_v46, %v1787_v39  ;;  %v1367_v16 = vmul.f32 52.0, %v1319_v58  ;;  %v1528_v27 = vmul.f32 52.0, %v1480_v11  ;;  %v1788_v22 = vsel %vm3079_vm11, %v1594_v25, %v1724_v23  ;;  %v2520_v44 = vpop.eup %2519 }
 0x33a   :  { %v1915_v18 = vsel %vm3124_vm15, %v1366_v20, %v1851_v5  ;;  %v1662_v47 = vmul.f32 %v2518_v4, %v2815_v38  ;;  %v1663_v0 = vmul.f32 %v2520_v44, %v2821_v40  ;;  %v1596_v49 = vmul.f32 %v2518_v4, %v2826_v42 }
 0x33b   :  { %1963 = vst [vmem:[%s4387_s11 + $0x150] sm:$0xff] %v1915_v18  ;;  %v1852_v33 = vsel %vm3117_vm14, %v1528_v27, %v1788_v22  ;;  %v1597_v29 = vmul.f32 %v2520_v44, %v2830_v45 }
 0x33c   :  { %v1916_v35 = vsel %vm3144_vm1, %v1367_v16, %v1852_v33 }
 0x33d   :  { %1964 = vst [vmem:[%s4387_s11 + $0x158] sm:$0xff] %v1916_v35 }
 0x33e   :  { %v2522_v59 = vpop.eup %2521 }
 0x33f   :  { %v1482_v54 = vadd.f32 %v2522_v59, %v4227_v26  ;;  %v1726_v60 = vsel %vm3044_vm8, %v1662_v47, %v2522_v59  ;;  %v1321_v43 = vadd.f32 %v2522_v59, %v4239_v55 }
 0x340   :  { %v2524_v56 = vpop.eup %2523  ;;  %v1790_v40 = vsel %vm3072_vm10, %v1596_v49, %v1726_v60 }
 0x341   :  { %v1483_v62 = vadd.f32 %v2524_v56, %v4227_v26  ;;  %v1530_v19 = vmul.f32 52.0, %v1482_v54  ;;  %v1727_v57 = vsel %vm3059_vm9, %v1663_v0, %v2524_v56  ;;  %v1322_v38 = vadd.f32 %v2524_v56, %v4239_v55 }
 0x342   :  { %v1369_v21 = vmul.f32 52.0, %v1321_v43  ;;  %v1791_v42 = vsel %vm3079_vm11, %v1597_v29, %v1727_v57 }
 0x343   :  { %v1531_v48 = vmul.f32 52.0, %v1483_v62  ;;  %v1854_v7 = vsel %vm3099_vm13, %v1530_v19, %v1790_v40  ;;  %v1370_v3 = vmul.f32 52.0, %v1322_v38 }
 0x344   :  { %v1918_v15 = vsel %vm3124_vm15, %v1369_v21, %v1854_v7 }
 0x345   :  { %v1855_v26 = vsel %vm3117_vm14, %v1531_v48, %v1791_v42  ;;  %1966 = vst [vmem:[%s4387_s11 + $0x168] sm:$0xff] %v1918_v15 }
 0x346   :  { %v1919_v45 = vsel %vm3144_vm1, %v1370_v3, %v1855_v26 }
 0x347   :  { %1967 = vst [vmem:[%s4387_s11 + $0x170] sm:$0xff] %v1919_v45 }

</bundles_post_ra>
